<compile_context>
chip_gen: v6e
topology: v6e:2x2x1
jax: 0.10.0
libtpu: 0.0.40
codegen_flags: <defaults>
</compile_context>

<pallas_src>
import functools
import math

import jax
import jax.numpy as jnp
from jax import lax
from jax.experimental import pallas as pl
from jax.experimental.pallas import tpu as pltpu

NEG = -1e9  # effectively -inf for f32 softmax (exp underflows to exactly 0)


def _pick_tile(n, preferred, align):
    """Largest tile <= preferred that is a multiple of `align` and divides n.

    Falls back to the full dimension (block == array dim is always legal)."""
    if n <= preferred:
        return n
    t = (preferred // align) * align
    while t >= align:
        if n % t == 0:
            return t
        t -= align
    return n


# ------------------------------- fused linear ----------------------------------
def _linear_kernel(x_ref, w_ref, b_ref, o_ref):
    y = jnp.dot(x_ref[...], w_ref[...], preferred_element_type=jnp.float32)
    o_ref[...] = (y + b_ref[...]).astype(o_ref.dtype)


def linear(x, w, b):
    M, K = x.shape
    N = w.shape[1]
    tm = _pick_tile(M, 256, 8)
    return pl.pallas_call(
        _linear_kernel,
        grid=(M // tm,),
        out_shape=jax.ShapeDtypeStruct((M, N), jnp.float32),
        in_specs=[pl.BlockSpec((tm, K), lambda i: (i, 0)),
                  pl.BlockSpec((K, N), lambda i: (0, 0)),
                  pl.BlockSpec((1, N), lambda i: (0, 0))],
        out_specs=pl.BlockSpec((tm, N), lambda i: (i, 0)),
        compiler_params=pltpu.CompilerParams(dimension_semantics=("parallel",)),
    )(x, w, b.reshape(1, N))


# -------------------- output projection + residual + LayerNorm -----------------
def _proj_add_ln_kernel(x_ref, w_ref, b_ref, r_ref, g_ref, bt_ref, o_ref, *, eps):
    y = jnp.dot(x_ref[...], w_ref[...], preferred_element_type=jnp.float32)
    y = y + b_ref[...] + r_ref[...]
    mean = jnp.mean(y, axis=-1, keepdims=True)
    var = jnp.mean((y - mean) ** 2, axis=-1, keepdims=True)
    yn = (y - mean) * lax.rsqrt(var + eps)
    o_ref[...] = (yn * g_ref[...] + bt_ref[...]).astype(o_ref.dtype)


def proj_add_layernorm(x, w, b, residual, gamma, beta, eps=1e-5):
    M, K = x.shape
    N = w.shape[1]
    tm = _pick_tile(M, 256, 8)
    return pl.pallas_call(
        functools.partial(_proj_add_ln_kernel, eps=eps),
        grid=(M // tm,),
        out_shape=jax.ShapeDtypeStruct((M, N), jnp.float32),
        in_specs=[pl.BlockSpec((tm, K), lambda i: (i, 0)),
                  pl.BlockSpec((K, N), lambda i: (0, 0)),
                  pl.BlockSpec((1, N), lambda i: (0, 0)),
                  pl.BlockSpec((tm, N), lambda i: (i, 0)),
                  pl.BlockSpec((1, N), lambda i: (0, 0)),
                  pl.BlockSpec((1, N), lambda i: (0, 0))],
        out_specs=pl.BlockSpec((tm, N), lambda i: (i, 0)),
        compiler_params=pltpu.CompilerParams(dimension_semantics=("parallel",)),
    )(x, w, b.reshape(1, N), residual, gamma.reshape(1, N), beta.reshape(1, N))


# ------------------------------- attention core ---------------------------------
def _attention_kernel(*refs, H, Dh, packed, has_attn_mask, has_kpm, with_probs):
    i = 0
    if packed:
        qkv_ref = refs[i]; i += 1
    else:
        q_ref = refs[i]; kv_ref = refs[i + 1]; i += 2
    am_ref = None
    if has_attn_mask:
        am_ref = refs[i]; i += 1
    kpm_ref = None
    if has_kpm:
        kpm_ref = refs[i]; i += 1
    o_ref = refs[i]; i += 1
    p_ref = refs[i] if with_probs else None

    D = H * Dh
    if packed:
        qkv = qkv_ref[0]                       # (T, 3D)
        q_all = qkv[:, 0:D]
        k_all = qkv[:, D:2 * D]
        v_all = qkv[:, 2 * D:3 * D]
    else:
        q_all = q_ref[0]                       # (T, D)
        kv = kv_ref[0]                         # (S, 2D)
        k_all = kv[:, 0:D]
        v_all = kv[:, D:2 * D]

    add_mask = None
    if has_attn_mask:
        add_mask = am_ref[...]                 # (T, S) additive
    if has_kpm:
        kpm = kpm_ref[0]                       # (1, S) additive, broadcasts over T
        add_mask = kpm if add_mask is None else add_mask + kpm

    outs = []
    p_sum = None
    for h in range(H):                         # static unroll over heads
        lo = h * Dh
        qh = q_all[:, lo:lo + Dh]              # (T, Dh)  (q already pre-scaled)
        kh = k_all[:, lo:lo + Dh]              # (S, Dh)
        vh = v_all[:, lo:lo + Dh]              # (S, Dh)
        s = lax.dot_general(qh, kh, (((1,), (1,)), ((), ())),
                            preferred_element_type=jnp.float32)   # (T, S)
        if add_mask is not None:
            s = s + add_mask
        m = jnp.max(s, axis=-1, keepdims=True)
        e = jnp.exp(s - m)
        denom = jnp.sum(e, axis=-1, keepdims=True)
        p = e * pl.reciprocal(denom, approx=True)                 # EUP, not VALU
        outs.append(jnp.dot(p, vh, preferred_element_type=jnp.float32))
        if with_probs:
            p_sum = p if p_sum is None else p_sum + p

    o = jnp.concatenate(outs, axis=-1)         # (T, D) lane-dense
    o_ref[0] = o.astype(o_ref.dtype)
    if with_probs:
        p_ref[0] = (p_sum * (1.0 / H)).astype(p_ref.dtype)


def self_attention(qkv, attn_mask, *, H, Dh):
    # qkv: (B, T, 3D) packed projections; attn_mask: (T, T) additive (causal).
    B, T, threeD = qkv.shape
    D = H * Dh
    kernel = functools.partial(_attention_kernel, H=H, Dh=Dh, packed=True,
                               has_attn_mask=True, has_kpm=False, with_probs=False)
    return pl.pallas_call(
        kernel,
        grid=(B,),
        out_shape=jax.ShapeDtypeStruct((B, T, D), jnp.float32),
        in_specs=[pl.BlockSpec((1, T, threeD), lambda b: (b, 0, 0)),
                  pl.BlockSpec((T, T), lambda b: (0, 0))],
        out_specs=pl.BlockSpec((1, T, D), lambda b: (b, 0, 0)),
        compiler_params=pltpu.CompilerParams(dimension_semantics=("parallel",)),
    )(qkv, attn_mask)


def cross_attention(q, kv, key_pad_add, *, H, Dh):
    # q: (B, T, D); kv: (B, S, 2D); key_pad_add: (B, 1, S) additive mask.
    # Returns (context (B,T,D), head-averaged attn (B,T,S)).
    B, T, D = q.shape
    S = kv.shape[1]
    kernel = functools.partial(_attention_kernel, H=H, Dh=Dh, packed=False,
                               has_attn_mask=False, has_kpm=True, with_probs=True)
    out, probs = pl.pallas_call(
        kernel,
        grid=(B,),
        out_shape=(jax.ShapeDtypeStruct((B, T, D), jnp.float32),
                   jax.ShapeDtypeStruct((B, T, S), jnp.float32)),
        in_specs=[pl.BlockSpec((1, T, D), lambda b: (b, 0, 0)),
                  pl.BlockSpec((1, S, 2 * D), lambda b: (b, 0, 0)),
                  pl.BlockSpec((1, 1, S), lambda b: (b, 0, 0))],
        out_specs=(pl.BlockSpec((1, T, D), lambda b: (b, 0, 0)),
                   pl.BlockSpec((1, T, S), lambda b: (b, 0, 0))),
        compiler_params=pltpu.CompilerParams(dimension_semantics=("parallel",)),
    )(q, kv, key_pad_add)
    return out, probs


# ------------------ fused FFN: fc1 -> relu -> fc2 -> +res -> LN ------------------
def _ffn_kernel(x_ref, w1_ref, b1_ref, w2_ref, b2_ref, g_ref, bt_ref,
                o_ref, acc_ref, *, eps):
    fi = pl.program_id(1)

    @pl.when(fi == 0)
    def _():
        acc_ref[...] = jnp.zeros_like(acc_ref)

    h = jnp.dot(x_ref[...], w1_ref[...], preferred_element_type=jnp.float32)
    h = jnp.maximum(h + b1_ref[...], 0.0)                       # relu(fc1)
    acc_ref[...] += jnp.dot(h, w2_ref[...], preferred_element_type=jnp.float32)

    @pl.when(fi == pl.num_programs(1) - 1)
    def _():
        y = acc_ref[...] + b2_ref[...] + x_ref[...]             # fc2 bias + residual
        mean = jnp.mean(y, axis=-1, keepdims=True)
        var = jnp.mean((y - mean) ** 2, axis=-1, keepdims=True)
        yn = (y - mean) * lax.rsqrt(var + eps)
        o_ref[...] = (yn * g_ref[...] + bt_ref[...]).astype(o_ref.dtype)


def ffn_add_layernorm(x, w1, b1, w2, b2, gamma, beta, eps=1e-5):
    M, D = x.shape
    F = w1.shape[1]
    tm = _pick_tile(M, 256, 8)
    tf = _pick_tile(F, 512, 128)
    return pl.pallas_call(
        functools.partial(_ffn_kernel, eps=eps),
        grid=(M // tm, F // tf),
        out_shape=jax.ShapeDtypeStruct((M, D), jnp.float32),
        in_specs=[pl.BlockSpec((tm, D), lambda i, j: (i, 0)),
                  pl.BlockSpec((D, tf), lambda i, j: (0, j)),
                  pl.BlockSpec((1, tf), lambda i, j: (0, j)),
                  pl.BlockSpec((tf, D), lambda i, j: (j, 0)),
                  pl.BlockSpec((1, D), lambda i, j: (0, 0)),
                  pl.BlockSpec((1, D), lambda i, j: (0, 0)),
                  pl.BlockSpec((1, D), lambda i, j: (0, 0))],
        out_specs=pl.BlockSpec((tm, D), lambda i, j: (i, 0)),
        scratch_shapes=[pltpu.VMEM((tm, D), jnp.float32)],
        compiler_params=pltpu.CompilerParams(
            dimension_semantics=("parallel", "arbitrary")),
    )(x, w1, b1.reshape(1, F), w2, b2.reshape(1, D),
      gamma.reshape(1, D), beta.reshape(1, D))


# -------------------------------- layer forward ----------------------------------
def decoder_layer_forward(x, encoder_out, encoder_padding_mask, self_attn_mask,
                          params, num_heads):
    T, B, D = x.shape
    S = encoder_out.shape[0]
    H = num_heads
    Dh = D // H

    # Single layout change to batch-major / lane-dense (B*T, D); all kernels keep
    # D on the lane axis — no per-attention split/merge-head HBM transposes.
    xb = jnp.transpose(x, (1, 0, 2))                 # (B, T, D)
    encb = jnp.transpose(encoder_out, (1, 0, 2))     # (B, S, D)
    x_flat = xb.reshape(B * T, D)
    enc_flat = encb.reshape(B * S, D)

    # -- self attention: fused QKV projection, causal mask broadcast in-kernel --
    sa = params["self_attn"]
    qkv = linear(x_flat, sa["w_qkv"], sa["b_qkv"]).reshape(B, T, 3 * D)
    sa_ctx = self_attention(qkv, self_attn_mask.astype(jnp.float32), H=H, Dh=Dh)
    x1 = proj_add_layernorm(sa_ctx.reshape(B * T, D), sa["wo"], sa["bo"],
                            x_flat, params["ln1_g"], params["ln1_b"])

    # -- encoder-decoder attention: fused KV projection, key-pad mask in-kernel --
    ea = params["enc_attn"]
    q1 = linear(x1, ea["wq"], ea["bq"]).reshape(B, T, D)            # q pre-scaled
    kv_e = linear(enc_flat, ea["w_kv"], ea["b_kv"]).reshape(B, S, 2 * D)
    pad_add = jnp.where(encoder_padding_mask, NEG, 0.0).astype(jnp.float32)
    pad_add = pad_add.reshape(B, 1, S)                              # tiny, not B*H*T*S
    ea_ctx, attn = cross_attention(q1, kv_e, pad_add, H=H, Dh=Dh)
    x2 = proj_add_layernorm(ea_ctx.reshape(B * T, D), ea["wo"], ea["bo"],
                            x1, params["ln2_g"], params["ln2_b"])

    # -- fused feed-forward + residual + LayerNorm --
    x3 = ffn_add_layernorm(x2, params["w_fc1"], params["b_fc1"],
                           params["w_fc2"], params["b_fc2"],
                           params["ln3_g"], params["ln3_b"])

    out = jnp.transpose(x3.reshape(B, T, D), (1, 0, 2))             # back to (T,B,D)
    return out, attn                                                # attn: (B, T, S)


# -------------------------------- parameter init ----------------------------------
def _xavier(key, fan_in, fan_out):
    bound = math.sqrt(6.0 / (fan_in + fan_out))
    # stored as (in, out) so kernels compute x @ w
    return jax.random.uniform(key, (fan_in, fan_out), jnp.float32, -bound, bound)


def init_params(key, D, H, FFN):
    Dh = D // H
    scale = Dh ** -0.5
    keys = jax.random.split(key, 10)

    def attn_block(ks, self_attn):
        wq = _xavier(ks[0], D, D) * scale          # fold 1/sqrt(Dh) into q weights
        bq = jnp.zeros((D,), jnp.float32) * scale
        wk = _xavier(ks[1], D, D)
        wv = _xavier(ks[2], D, D)
        wo = _xavier(ks[3], D, D)
        if self_attn:
            return {"w_qkv": jnp.concatenate([wq, wk, wv], axis=1),
                    "b_qkv": jnp.concatenate([bq,
                                              jnp.zeros((D,), jnp.float32),
                                              jnp.zeros((D,), jnp.float32)]),
                    "wo": wo, "bo": jnp.zeros((D,), jnp.float32)}
        return {"wq": wq, "bq": bq,
                "w_kv": jnp.concatenate([wk, wv], axis=1),
                "b_kv": jnp.zeros((2 * D,), jnp.float32),
                "wo": wo, "bo": jnp.zeros((D,), jnp.float32)}

    return {
        "self_attn": attn_block(keys[0:4], True),
        "enc_attn": attn_block(keys[4:8], False),
        "w_fc1": _xavier(keys[8], D, FFN), "b_fc1": jnp.zeros((FFN,), jnp.float32),
        "w_fc2": _xavier(keys[9], FFN, D), "b_fc2": jnp.zeros((D,), jnp.float32),
        "ln1_g": jnp.ones((D,), jnp.float32), "ln1_b": jnp.zeros((D,), jnp.float32),
        "ln2_g": jnp.ones((D,), jnp.float32), "ln2_b": jnp.zeros((D,), jnp.float32),
        "ln3_g": jnp.ones((D,), jnp.float32), "ln3_b": jnp.zeros((D,), jnp.float32),
    }


# ------------------------------------- main ----------------------------------------
if __name__ == "__main__":
    T, S, B = 8, 8, 2          # tgt_len, src_len, batch
    D, H, FFN = 32, 4, 64      # decoder_embed_dim, heads, decoder_ffn_embed_dim

    key = jax.random.PRNGKey(0)
    k_x, k_enc, k_p = jax.random.split(key, 3)

    x = jax.random.normal(k_x, (T, B, D), jnp.float32)
    encoder_out = jax.random.normal(k_enc, (S, B, D), jnp.float32)
    # padding mask: last two source positions of batch element 1 are padding
    encoder_padding_mask = jnp.zeros((B, S), jnp.bool_).at[1, S - 2:].set(True)
    # causal (future) additive mask, as in fairseq buffered_future_mask
    self_attn_mask = jnp.triu(jnp.full((T, T), NEG, jnp.float32), k=1)

    params = init_params(k_p, D, H, FFN)

    # TODO(synk): incremental_state / prev_*_attn_state KV caching paths are not
    # modeled (decode-time cache mechanics, not part of the dense forward math).
    fwd = jax.jit(functools.partial(decoder_layer_forward, num_heads=H))
    out, attn = fwd(x, encoder_out, encoder_padding_mask, self_attn_mask, params)
    jax.block_until_ready((out, attn))

    assert out.shape == (T, B, D) and attn.shape == (B, T, S)
    assert bool(jnp.all(jnp.isfinite(out))) and bool(jnp.all(jnp.isfinite(attn)))
    print("KERNEL_OK")
</pallas_src>

<mosaic_0001>
module attributes {stable_mosaic.version = 11 : i64} {
  func.func @_linear_kernel(%arg0: i32, %arg1: memref<16x32xf32, #tpu.memory_space<vmem>>, %arg2: memref<32x96xf32, #tpu.memory_space<vmem>>, %arg3: memref<1x96xf32, #tpu.memory_space<vmem>>, %arg4: memref<16x96xf32, #tpu.memory_space<vmem>>) attributes {dimension_semantics = [#tpu.dimension_semantics<parallel>], iteration_bounds = array<i64: 1>, scalar_prefetch = 0 : i64, scratch_operands = 0 : i64, tpu.core_type = #tpu.core_type<tc>, window_params = [{transform_indices = @transform_0, window_bounds = array<i64: 16, 32>}, {pipeline_mode = #tpu.pipeline_mode<synchronous>, transform_indices = @transform_1, window_bounds = array<i64: 32, 96>}, {pipeline_mode = #tpu.pipeline_mode<synchronous>, transform_indices = @transform_2, window_bounds = array<i64: 1, 96>}, {transform_indices = @transform_3, window_bounds = array<i64: 16, 96>}]} {
    %c0 = arith.constant 0 : index
    %c0_0 = arith.constant 0 : index
    %0 = vector.load %arg1[%c0, %c0_0] : memref<16x32xf32, #tpu.memory_space<vmem>>, vector<16x32xf32>
    %c0_1 = arith.constant 0 : index
    %c0_2 = arith.constant 0 : index
    %1 = vector.load %arg2[%c0_1, %c0_2] : memref<32x96xf32, #tpu.memory_space<vmem>>, vector<32x96xf32>
    %cst = arith.constant dense<0.000000e+00> : vector<16x96xf32>
    %2 = tpu.matmul %0, %1, %cst {dimension_numbers = #tpu.dot_dimension_numbers<[1], [0], [0], [1], [0, 0, 1, 1], [], []>} : vector<16x32xf32>, vector<32x96xf32>, vector<16x96xf32> -> vector<16x96xf32>
    %c0_3 = arith.constant 0 : index
    %c0_4 = arith.constant 0 : index
    %3 = vector.load %arg3[%c0_3, %c0_4] : memref<1x96xf32, #tpu.memory_space<vmem>>, vector<1x96xf32>
    %4 = vector.broadcast %3 : vector<1x96xf32> to vector<16x96xf32>
    %5 = arith.addf %2, %4 : vector<16x96xf32>
    %c0_5 = arith.constant 0 : index
    %c0_6 = arith.constant 0 : index
    %6 = vector.load %arg4[%c0_5, %c0_6] : memref<16x96xf32, #tpu.memory_space<vmem>>, vector<16x96xf32>
    tpu.vector_store %arg4[%c0_5, %c0_6], %5 {strides = array<i32>} : memref<16x96xf32, #tpu.memory_space<vmem>>, vector<16x96xf32>,
    return
  }
  func.func @transform_0(%arg0: i32) -> (i32, i32) {
    %c0_i32 = arith.constant 0 : i32
    %c0_i32_0 = arith.constant 0 : i32
    return %arg0, %c0_i32 : i32, i32
  }
  func.func @transform_1(%arg0: i32) -> (i32, i32) {
    %c0_i32 = arith.constant 0 : i32
    %c0_i32_0 = arith.constant 0 : i32
    %c0_i32_1 = arith.constant 0 : i32
    return %c0_i32, %c0_i32_0 : i32, i32
  }
  func.func @transform_2(%arg0: i32) -> (i32, i32) {
    %c0_i32 = arith.constant 0 : i32
    %c0_i32_0 = arith.constant 0 : i32
    %c0_i32_1 = arith.constant 0 : i32
    return %c0_i32, %c0_i32_0 : i32, i32
  }
  func.func @transform_3(%arg0: i32) -> (i32, i32) {
    %c0_i32 = arith.constant 0 : i32
    %c0_i32_0 = arith.constant 0 : i32
    return %arg0, %c0_i32 : i32, i32
  }
}

module attributes {stable_mosaic.version = 11 : i64} {
  func.func @_attention_kernel(%arg0: i32, %arg1: memref<1x8x96xf32, #tpu.memory_space<vmem>>, %arg2: memref<8x8xf32, #tpu.memory_space<vmem>>, %arg3: memref<1x8x32xf32, #tpu.memory_space<vmem>>) attributes {dimension_semantics = [#tpu.dimension_semantics<parallel>], iteration_bounds = array<i64: 2>, scalar_prefetch = 0 : i64, scratch_operands = 0 : i64, tpu.core_type = #tpu.core_type<tc>, window_params = [{transform_indices = @transform_0, window_bounds = array<i64: 1, 8, 96>}, {pipeline_mode = #tpu.pipeline_mode<synchronous>, transform_indices = @transform_1, window_bounds = array<i64: 8, 8>}, {transform_indices = @transform_2, window_bounds = array<i64: 1, 8, 32>}]} {
    %c0 = arith.constant 0 : index
    %c0_0 = arith.constant 0 : index
    %c0_1 = arith.constant 0 : index
    %0 = vector.load %arg1[%c0, %c0_0, %c0_1] : memref<1x8x96xf32, #tpu.memory_space<vmem>>, vector<1x8x96xf32>
    %1 = vector.shape_cast %0 : vector<1x8x96xf32> to vector<8x96xf32>
    %2 = vector.extract_strided_slice %1 {offsets = [0, 0], sizes = [8, 32], strides = [1, 1]} : vector<8x96xf32> to vector<8x32xf32>
    %3 = vector.extract_strided_slice %1 {offsets = [0, 32], sizes = [8, 32], strides = [1, 1]} : vector<8x96xf32> to vector<8x32xf32>
    %4 = vector.extract_strided_slice %1 {offsets = [0, 64], sizes = [8, 32], strides = [1, 1]} : vector<8x96xf32> to vector<8x32xf32>
    %c0_2 = arith.constant 0 : index
    %c0_3 = arith.constant 0 : index
    %5 = vector.load %arg2[%c0_2, %c0_3] : memref<8x8xf32, #tpu.memory_space<vmem>>, vector<8x8xf32>
    %6 = vector.extract_strided_slice %2 {offsets = [0, 0], sizes = [8, 8], strides = [1, 1]} : vector<8x32xf32> to vector<8x8xf32>
    %7 = vector.extract_strided_slice %3 {offsets = [0, 0], sizes = [8, 8], strides = [1, 1]} : vector<8x32xf32> to vector<8x8xf32>
    %8 = vector.extract_strided_slice %4 {offsets = [0, 0], sizes = [8, 8], strides = [1, 1]} : vector<8x32xf32> to vector<8x8xf32>
    %cst = arith.constant dense<0.000000e+00> : vector<8x8xf32>
    %9 = tpu.matmul %6, %7, %cst {dimension_numbers = #tpu.dot_dimension_numbers<[1], [1], [0], [0], [0, 0, 1, 0], [], []>} : vector<8x8xf32>, vector<8x8xf32>, vector<8x8xf32> -> vector<8x8xf32>
    %10 = arith.addf %9, %5 : vector<8x8xf32>
    %cst_4 = arith.constant dense<0xFF800000> : vector<8xf32>
    %11 = vector.multi_reduction <maximumf>, %10, %cst_4 [1] : vector<8x8xf32> to vector<8xf32>
    %12 = vector.shape_cast %11 : vector<8xf32> to vector<8x1xf32>
    %13 = vector.broadcast %12 : vector<8x1xf32> to vector<8x8xf32>
    %14 = arith.subf %10, %13 : vector<8x8xf32>
    %15 = math.exp %14 : vector<8x8xf32>
    %cst_5 = arith.constant dense<0.000000e+00> : vector<8xf32>
    %16 = vector.multi_reduction <add>, %15, %cst_5 [1] : vector<8x8xf32> to vector<8xf32>
    %17 = vector.shape_cast %16 : vector<8xf32> to vector<8x1xf32>
    %18 = tpu.reciprocal %17 {approx = true} : vector<8x1xf32> -> vector<8x1xf32>
    %19 = vector.broadcast %18 : vector<8x1xf32> to vector<8x8xf32>
    %20 = arith.mulf %15, %19 : vector<8x8xf32>
    %cst_6 = arith.constant dense<0.000000e+00> : vector<8x8xf32>
    %21 = tpu.matmul %20, %8, %cst_6 {dimension_numbers = #tpu.dot_dimension_numbers<[1], [0], [0], [1], [0, 0, 1, 1], [], []>} : vector<8x8xf32>, vector<8x8xf32>, vector<8x8xf32> -> vector<8x8xf32>
    %22 = vector.extract_strided_slice %2 {offsets = [0, 8], sizes = [8, 8], strides = [1, 1]} : vector<8x32xf32> to vector<8x8xf32>
    %23 = vector.extract_strided_slice %3 {offsets = [0, 8], sizes = [8, 8], strides = [1, 1]} : vector<8x32xf32> to vector<8x8xf32>
    %24 = vector.extract_strided_slice %4 {offsets = [0, 8], sizes = [8, 8], strides = [1, 1]} : vector<8x32xf32> to vector<8x8xf32>
    %cst_7 = arith.constant dense<0.000000e+00> : vector<8x8xf32>
    %25 = tpu.matmul %22, %23, %cst_7 {dimension_numbers = #tpu.dot_dimension_numbers<[1], [1], [0], [0], [0, 0, 1, 0], [], []>} : vector<8x8xf32>, vector<8x8xf32>, vector<8x8xf32> -> vector<8x8xf32>
    %26 = arith.addf %25, %5 : vector<8x8xf32>
    %cst_8 = arith.constant dense<0xFF800000> : vector<8xf32>
    %27 = vector.multi_reduction <maximumf>, %26, %cst_8 [1] : vector<8x8xf32> to vector<8xf32>
    %28 = vector.shape_cast %27 : vector<8xf32> to vector<8x1xf32>
    %29 = vector.broadcast %28 : vector<8x1xf32> to vector<8x8xf32>
    %30 = arith.subf %26, %29 : vector<8x8xf32>
    %31 = math.exp %30 : vector<8x8xf32>
    %cst_9 = arith.constant dense<0.000000e+00> : vector<8xf32>
    %32 = vector.multi_reduction <add>, %31, %cst_9 [1] : vector<8x8xf32> to vector<8xf32>
    %33 = vector.shape_cast %32 : vector<8xf32> to vector<8x1xf32>
    %34 = tpu.reciprocal %33 {approx = true} : vector<8x1xf32> -> vector<8x1xf32>
    %35 = vector.broadcast %34 : vector<8x1xf32> to vector<8x8xf32>
    %36 = arith.mulf %31, %35 : vector<8x8xf32>
    %cst_10 = arith.constant dense<0.000000e+00> : vector<8x8xf32>
    %37 = tpu.matmul %36, %24, %cst_10 {dimension_numbers = #tpu.dot_dimension_numbers<[1], [0], [0], [1], [0, 0, 1, 1], [], []>} : vector<8x8xf32>, vector<8x8xf32>, vector<8x8xf32> -> vector<8x8xf32>
    %38 = vector.extract_strided_slice %2 {offsets = [0, 16], sizes = [8, 8], strides = [1, 1]} : vector<8x32xf32> to vector<8x8xf32>
    %39 = vector.extract_strided_slice %3 {offsets = [0, 16], sizes = [8, 8], strides = [1, 1]} : vector<8x32xf32> to vector<8x8xf32>
    %40 = vector.extract_strided_slice %4 {offsets = [0, 16], sizes = [8, 8], strides = [1, 1]} : vector<8x32xf32> to vector<8x8xf32>
    %cst_11 = arith.constant dense<0.000000e+00> : vector<8x8xf32>
    %41 = tpu.matmul %38, %39, %cst_11 {dimension_numbers = #tpu.dot_dimension_numbers<[1], [1], [0], [0], [0, 0, 1, 0], [], []>} : vector<8x8xf32>, vector<8x8xf32>, vector<8x8xf32> -> vector<8x8xf32>
    %42 = arith.addf %41, %5 : vector<8x8xf32>
    %cst_12 = arith.constant dense<0xFF800000> : vector<8xf32>
    %43 = vector.multi_reduction <maximumf>, %42, %cst_12 [1] : vector<8x8xf32> to vector<8xf32>
    %44 = vector.shape_cast %43 : vector<8xf32> to vector<8x1xf32>
    %45 = vector.broadcast %44 : vector<8x1xf32> to vector<8x8xf32>
    %46 = arith.subf %42, %45 : vector<8x8xf32>
    %47 = math.exp %46 : vector<8x8xf32>
    %cst_13 = arith.constant dense<0.000000e+00> : vector<8xf32>
    %48 = vector.multi_reduction <add>, %47, %cst_13 [1] : vector<8x8xf32> to vector<8xf32>
    %49 = vector.shape_cast %48 : vector<8xf32> to vector<8x1xf32>
    %50 = tpu.reciprocal %49 {approx = true} : vector<8x1xf32> -> vector<8x1xf32>
    %51 = vector.broadcast %50 : vector<8x1xf32> to vector<8x8xf32>
    %52 = arith.mulf %47, %51 : vector<8x8xf32>
    %cst_14 = arith.constant dense<0.000000e+00> : vector<8x8xf32>
    %53 = tpu.matmul %52, %40, %cst_14 {dimension_numbers = #tpu.dot_dimension_numbers<[1], [0], [0], [1], [0, 0, 1, 1], [], []>} : vector<8x8xf32>, vector<8x8xf32>, vector<8x8xf32> -> vector<8x8xf32>
    %54 = vector.extract_strided_slice %2 {offsets = [0, 24], sizes = [8, 8], strides = [1, 1]} : vector<8x32xf32> to vector<8x8xf32>
    %55 = vector.extract_strided_slice %3 {offsets = [0, 24], sizes = [8, 8], strides = [1, 1]} : vector<8x32xf32> to vector<8x8xf32>
    %56 = vector.extract_strided_slice %4 {offsets = [0, 24], sizes = [8, 8], strides = [1, 1]} : vector<8x32xf32> to vector<8x8xf32>
    %cst_15 = arith.constant dense<0.000000e+00> : vector<8x8xf32>
    %57 = tpu.matmul %54, %55, %cst_15 {dimension_numbers = #tpu.dot_dimension_numbers<[1], [1], [0], [0], [0, 0, 1, 0], [], []>} : vector<8x8xf32>, vector<8x8xf32>, vector<8x8xf32> -> vector<8x8xf32>
    %58 = arith.addf %57, %5 : vector<8x8xf32>
    %cst_16 = arith.constant dense<0xFF800000> : vector<8xf32>
    %59 = vector.multi_reduction <maximumf>, %58, %cst_16 [1] : vector<8x8xf32> to vector<8xf32>
    %60 = vector.shape_cast %59 : vector<8xf32> to vector<8x1xf32>
    %61 = vector.broadcast %60 : vector<8x1xf32> to vector<8x8xf32>
    %62 = arith.subf %58, %61 : vector<8x8xf32>
    %63 = math.exp %62 : vector<8x8xf32>
    %cst_17 = arith.constant dense<0.000000e+00> : vector<8xf32>
    %64 = vector.multi_reduction <add>, %63, %cst_17 [1] : vector<8x8xf32> to vector<8xf32>
    %65 = vector.shape_cast %64 : vector<8xf32> to vector<8x1xf32>
    %66 = tpu.reciprocal %65 {approx = true} : vector<8x1xf32> -> vector<8x1xf32>
    %67 = vector.broadcast %66 : vector<8x1xf32> to vector<8x8xf32>
    %68 = arith.mulf %63, %67 : vector<8x8xf32>
    %cst_18 = arith.constant dense<0.000000e+00> : vector<8x8xf32>
    %69 = tpu.matmul %68, %56, %cst_18 {dimension_numbers = #tpu.dot_dimension_numbers<[1], [0], [0], [1], [0, 0, 1, 1], [], []>} : vector<8x8xf32>, vector<8x8xf32>, vector<8x8xf32> -> vector<8x8xf32>
    %70 = tpu.concatenate %21, %37, %53, %69 in 1 : vector<8x8xf32>, vector<8x8xf32>, vector<8x8xf32>, vector<8x8xf32> -> vector<8x32xf32>
    %c0_19 = arith.constant 0 : index
    %c0_20 = arith.constant 0 : index
    %c0_21 = arith.constant 0 : index
    %71 = vector.load %arg3[%c0_19, %c0_20, %c0_21] : memref<1x8x32xf32, #tpu.memory_space<vmem>>, vector<1x8x32xf32>
    %72 = vector.shape_cast %71 : vector<1x8x32xf32> to vector<8x32xf32>
    %73 = vector.shape_cast %70 : vector<8x32xf32> to vector<1x8x32xf32>
    tpu.vector_store %arg3[%c0_19, %c0_20, %c0_21], %73 {strides = array<i32>} : memref<1x8x32xf32, #tpu.memory_space<vmem>>, vector<1x8x32xf32>,
    return
  }
  func.func @transform_0(%arg0: i32) -> (i32, i32, i32) {
    %c0_i32 = arith.constant 0 : i32
    %c0_i32_0 = arith.constant 0 : i32
    %c0_i32_1 = arith.constant 0 : i32
    return %arg0, %c0_i32, %c0_i32_0 : i32, i32, i32
  }
  func.func @transform_1(%arg0: i32) -> (i32, i32) {
    %c0_i32 = arith.constant 0 : i32
    %c0_i32_0 = arith.constant 0 : i32
    %c0_i32_1 = arith.constant 0 : i32
    return %c0_i32, %c0_i32_0 : i32, i32
  }
  func.func @transform_2(%arg0: i32) -> (i32, i32, i32) {
    %c0_i32 = arith.constant 0 : i32
    %c0_i32_0 = arith.constant 0 : i32
    %c0_i32_1 = arith.constant 0 : i32
    return %arg0, %c0_i32, %c0_i32_0 : i32, i32, i32
  }
}

module attributes {stable_mosaic.version = 11 : i64} {
  func.func @_proj_add_ln_kernel(%arg0: i32, %arg1: memref<16x32xf32, #tpu.memory_space<vmem>>, %arg2: memref<32x32xf32, #tpu.memory_space<vmem>>, %arg3: memref<1x32xf32, #tpu.memory_space<vmem>>, %arg4: memref<16x32xf32, #tpu.memory_space<vmem>>, %arg5: memref<1x32xf32, #tpu.memory_space<vmem>>, %arg6: memref<1x32xf32, #tpu.memory_space<vmem>>, %arg7: memref<16x32xf32, #tpu.memory_space<vmem>>) attributes {dimension_semantics = [#tpu.dimension_semantics<parallel>], iteration_bounds = array<i64: 1>, scalar_prefetch = 0 : i64, scratch_operands = 0 : i64, tpu.core_type = #tpu.core_type<tc>, window_params = [{transform_indices = @transform_0, window_bounds = array<i64: 16, 32>}, {pipeline_mode = #tpu.pipeline_mode<synchronous>, transform_indices = @transform_1, window_bounds = array<i64: 32, 32>}, {pipeline_mode = #tpu.pipeline_mode<synchronous>, transform_indices = @transform_2, window_bounds = array<i64: 1, 32>}, {transform_indices = @transform_3, window_bounds = array<i64: 16, 32>}, {pipeline_mode = #tpu.pipeline_mode<synchronous>, transform_indices = @transform_4, window_bounds = array<i64: 1, 32>}, {pipeline_mode = #tpu.pipeline_mode<synchronous>, transform_indices = @transform_5, window_bounds = array<i64: 1, 32>}, {transform_indices = @transform_6, window_bounds = array<i64: 16, 32>}]} {
    %c0 = arith.constant 0 : index
    %c0_0 = arith.constant 0 : index
    %0 = vector.load %arg1[%c0, %c0_0] : memref<16x32xf32, #tpu.memory_space<vmem>>, vector<16x32xf32>
    %c0_1 = arith.constant 0 : index
    %c0_2 = arith.constant 0 : index
    %1 = vector.load %arg2[%c0_1, %c0_2] : memref<32x32xf32, #tpu.memory_space<vmem>>, vector<32x32xf32>
    %cst = arith.constant dense<0.000000e+00> : vector<16x32xf32>
    %2 = tpu.matmul %0, %1, %cst {dimension_numbers = #tpu.dot_dimension_numbers<[1], [0], [0], [1], [0, 0, 1, 1], [], []>} : vector<16x32xf32>, vector<32x32xf32>, vector<16x32xf32> -> vector<16x32xf32>
    %c0_3 = arith.constant 0 : index
    %c0_4 = arith.constant 0 : index
    %3 = vector.load %arg3[%c0_3, %c0_4] : memref<1x32xf32, #tpu.memory_space<vmem>>, vector<1x32xf32>
    %4 = vector.broadcast %3 : vector<1x32xf32> to vector<16x32xf32>
    %5 = arith.addf %2, %4 : vector<16x32xf32>
    %c0_5 = arith.constant 0 : index
    %c0_6 = arith.constant 0 : index
    %6 = vector.load %arg4[%c0_5, %c0_6] : memref<16x32xf32, #tpu.memory_space<vmem>>, vector<16x32xf32>
    %7 = arith.addf %5, %6 : vector<16x32xf32>
    %cst_7 = arith.constant dense<0.000000e+00> : vector<16xf32>
    %8 = vector.multi_reduction <add>, %7, %cst_7 [1] : vector<16x32xf32> to vector<16xf32>
    %9 = vector.shape_cast %8 : vector<16xf32> to vector<16x1xf32>
    %cst_8 = arith.constant 3.200000e+01 : f32
    %10 = vector.broadcast %cst_8 : f32 to vector<16x1xf32>
    %11 = arith.divf %9, %10 : vector<16x1xf32>
    %12 = vector.broadcast %11 : vector<16x1xf32> to vector<16x32xf32>
    %13 = arith.subf %7, %12 : vector<16x32xf32>
    %14 = arith.mulf %13, %13 : vector<16x32xf32>
    %cst_9 = arith.constant dense<0.000000e+00> : vector<16xf32>
    %15 = vector.multi_reduction <add>, %14, %cst_9 [1] : vector<16x32xf32> to vector<16xf32>
    %16 = vector.shape_cast %15 : vector<16xf32> to vector<16x1xf32>
    %cst_10 = arith.constant 3.200000e+01 : f32
    %17 = vector.broadcast %cst_10 : f32 to vector<16x1xf32>
    %18 = arith.divf %16, %17 : vector<16x1xf32>
    %19 = vector.broadcast %11 : vector<16x1xf32> to vector<16x32xf32>
    %20 = arith.subf %7, %19 : vector<16x32xf32>
    %cst_11 = arith.constant 9.99999974E-6 : f32
    %21 = vector.broadcast %cst_11 : f32 to vector<16x1xf32>
    %22 = arith.addf %18, %21 : vector<16x1xf32>
    %23 = math.rsqrt %22 : vector<16x1xf32>
    %24 = vector.broadcast %23 : vector<16x1xf32> to vector<16x32xf32>
    %25 = arith.mulf %20, %24 : vector<16x32xf32>
    %c0_12 = arith.constant 0 : index
    %c0_13 = arith.constant 0 : index
    %26 = vector.load %arg5[%c0_12, %c0_13] : memref<1x32xf32, #tpu.memory_space<vmem>>, vector<1x32xf32>
    %27 = vector.broadcast %26 : vector<1x32xf32> to vector<16x32xf32>
    %28 = arith.mulf %25, %27 : vector<16x32xf32>
    %c0_14 = arith.constant 0 : index
    %c0_15 = arith.constant 0 : index
    %29 = vector.load %arg6[%c0_14, %c0_15] : memref<1x32xf32, #tpu.memory_space<vmem>>, vector<1x32xf32>
    %30 = vector.broadcast %29 : vector<1x32xf32> to vector<16x32xf32>
    %31 = arith.addf %28, %30 : vector<16x32xf32>
    %c0_16 = arith.constant 0 : index
    %c0_17 = arith.constant 0 : index
    %32 = vector.load %arg7[%c0_16, %c0_17] : memref<16x32xf32, #tpu.memory_space<vmem>>, vector<16x32xf32>
    tpu.vector_store %arg7[%c0_16, %c0_17], %31 {strides = array<i32>} : memref<16x32xf32, #tpu.memory_space<vmem>>, vector<16x32xf32>,
    return
  }
  func.func @transform_0(%arg0: i32) -> (i32, i32) {
    %c0_i32 = arith.constant 0 : i32
    %c0_i32_0 = arith.constant 0 : i32
    return %arg0, %c0_i32 : i32, i32
  }
  func.func @transform_1(%arg0: i32) -> (i32, i32) {
    %c0_i32 = arith.constant 0 : i32
    %c0_i32_0 = arith.constant 0 : i32
    %c0_i32_1 = arith.constant 0 : i32
    return %c0_i32, %c0_i32_0 : i32, i32
  }
  func.func @transform_2(%arg0: i32) -> (i32, i32) {
    %c0_i32 = arith.constant 0 : i32
    %c0_i32_0 = arith.constant 0 : i32
    %c0_i32_1 = arith.constant 0 : i32
    return %c0_i32, %c0_i32_0 : i32, i32
  }
  func.func @transform_3(%arg0: i32) -> (i32, i32) {
    %c0_i32 = arith.constant 0 : i32
    %c0_i32_0 = arith.constant 0 : i32
    return %arg0, %c0_i32 : i32, i32
  }
  func.func @transform_4(%arg0: i32) -> (i32, i32) {
    %c0_i32 = arith.constant 0 : i32
    %c0_i32_0 = arith.constant 0 : i32
    %c0_i32_1 = arith.constant 0 : i32
    return %c0_i32, %c0_i32_0 : i32, i32
  }
  func.func @transform_5(%arg0: i32) -> (i32, i32) {
    %c0_i32 = arith.constant 0 : i32
    %c0_i32_0 = arith.constant 0 : i32
    %c0_i32_1 = arith.constant 0 : i32
    return %c0_i32, %c0_i32_0 : i32, i32
  }
  func.func @transform_6(%arg0: i32) -> (i32, i32) {
    %c0_i32 = arith.constant 0 : i32
    %c0_i32_0 = arith.constant 0 : i32
    return %arg0, %c0_i32 : i32, i32
  }
}

module attributes {stable_mosaic.version = 11 : i64} {
  func.func @_linear_kernel(%arg0: i32, %arg1: memref<16x32xf32, #tpu.memory_space<vmem>>, %arg2: memref<32x32xf32, #tpu.memory_space<vmem>>, %arg3: memref<1x32xf32, #tpu.memory_space<vmem>>, %arg4: memref<16x32xf32, #tpu.memory_space<vmem>>) attributes {dimension_semantics = [#tpu.dimension_semantics<parallel>], iteration_bounds = array<i64: 1>, scalar_prefetch = 0 : i64, scratch_operands = 0 : i64, tpu.core_type = #tpu.core_type<tc>, window_params = [{transform_indices = @transform_0, window_bounds = array<i64: 16, 32>}, {pipeline_mode = #tpu.pipeline_mode<synchronous>, transform_indices = @transform_1, window_bounds = array<i64: 32, 32>}, {pipeline_mode = #tpu.pipeline_mode<synchronous>, transform_indices = @transform_2, window_bounds = array<i64: 1, 32>}, {transform_indices = @transform_3, window_bounds = array<i64: 16, 32>}]} {
    %c0 = arith.constant 0 : index
    %c0_0 = arith.constant 0 : index
    %0 = vector.load %arg1[%c0, %c0_0] : memref<16x32xf32, #tpu.memory_space<vmem>>, vector<16x32xf32>
    %c0_1 = arith.constant 0 : index
    %c0_2 = arith.constant 0 : index
    %1 = vector.load %arg2[%c0_1, %c0_2] : memref<32x32xf32, #tpu.memory_space<vmem>>, vector<32x32xf32>
    %cst = arith.constant dense<0.000000e+00> : vector<16x32xf32>
    %2 = tpu.matmul %0, %1, %cst {dimension_numbers = #tpu.dot_dimension_numbers<[1], [0], [0], [1], [0, 0, 1, 1], [], []>} : vector<16x32xf32>, vector<32x32xf32>, vector<16x32xf32> -> vector<16x32xf32>
    %c0_3 = arith.constant 0 : index
    %c0_4 = arith.constant 0 : index
    %3 = vector.load %arg3[%c0_3, %c0_4] : memref<1x32xf32, #tpu.memory_space<vmem>>, vector<1x32xf32>
    %4 = vector.broadcast %3 : vector<1x32xf32> to vector<16x32xf32>
    %5 = arith.addf %2, %4 : vector<16x32xf32>
    %c0_5 = arith.constant 0 : index
    %c0_6 = arith.constant 0 : index
    %6 = vector.load %arg4[%c0_5, %c0_6] : memref<16x32xf32, #tpu.memory_space<vmem>>, vector<16x32xf32>
    tpu.vector_store %arg4[%c0_5, %c0_6], %5 {strides = array<i32>} : memref<16x32xf32, #tpu.memory_space<vmem>>, vector<16x32xf32>,
    return
  }
  func.func @transform_0(%arg0: i32) -> (i32, i32) {
    %c0_i32 = arith.constant 0 : i32
    %c0_i32_0 = arith.constant 0 : i32
    return %arg0, %c0_i32 : i32, i32
  }
  func.func @transform_1(%arg0: i32) -> (i32, i32) {
    %c0_i32 = arith.constant 0 : i32
    %c0_i32_0 = arith.constant 0 : i32
    %c0_i32_1 = arith.constant 0 : i32
    return %c0_i32, %c0_i32_0 : i32, i32
  }
  func.func @transform_2(%arg0: i32) -> (i32, i32) {
    %c0_i32 = arith.constant 0 : i32
    %c0_i32_0 = arith.constant 0 : i32
    %c0_i32_1 = arith.constant 0 : i32
    return %c0_i32, %c0_i32_0 : i32, i32
  }
  func.func @transform_3(%arg0: i32) -> (i32, i32) {
    %c0_i32 = arith.constant 0 : i32
    %c0_i32_0 = arith.constant 0 : i32
    return %arg0, %c0_i32 : i32, i32
  }
}

module attributes {stable_mosaic.version = 11 : i64} {
  func.func @_attention_kernel(%arg0: i32, %arg1: memref<1x8x32xf32, #tpu.memory_space<vmem>>, %arg2: memref<1x8x64xf32, #tpu.memory_space<vmem>>, %arg3: memref<1x1x8xf32, #tpu.memory_space<vmem>>, %arg4: memref<1x8x32xf32, #tpu.memory_space<vmem>>, %arg5: memref<1x8x8xf32, #tpu.memory_space<vmem>>) attributes {dimension_semantics = [#tpu.dimension_semantics<parallel>], iteration_bounds = array<i64: 2>, scalar_prefetch = 0 : i64, scratch_operands = 0 : i64, tpu.core_type = #tpu.core_type<tc>, window_params = [{transform_indices = @transform_0, window_bounds = array<i64: 1, 8, 32>}, {transform_indices = @transform_1, window_bounds = array<i64: 1, 8, 64>}, {transform_indices = @transform_2, window_bounds = array<i64: 1, 1, 8>}, {transform_indices = @transform_3, window_bounds = array<i64: 1, 8, 32>}, {transform_indices = @transform_4, window_bounds = array<i64: 1, 8, 8>}]} {
    %c0 = arith.constant 0 : index
    %c0_0 = arith.constant 0 : index
    %c0_1 = arith.constant 0 : index
    %0 = vector.load %arg1[%c0, %c0_0, %c0_1] : memref<1x8x32xf32, #tpu.memory_space<vmem>>, vector<1x8x32xf32>
    %1 = vector.shape_cast %0 : vector<1x8x32xf32> to vector<8x32xf32>
    %c0_2 = arith.constant 0 : index
    %c0_3 = arith.constant 0 : index
    %c0_4 = arith.constant 0 : index
    %2 = vector.load %arg2[%c0_2, %c0_3, %c0_4] : memref<1x8x64xf32, #tpu.memory_space<vmem>>, vector<1x8x64xf32>
    %3 = vector.shape_cast %2 : vector<1x8x64xf32> to vector<8x64xf32>
    %4 = vector.extract_strided_slice %3 {offsets = [0, 0], sizes = [8, 32], strides = [1, 1]} : vector<8x64xf32> to vector<8x32xf32>
    %5 = vector.extract_strided_slice %3 {offsets = [0, 32], sizes = [8, 32], strides = [1, 1]} : vector<8x64xf32> to vector<8x32xf32>
    %c0_5 = arith.constant 0 : index
    %c0_6 = arith.constant 0 : index
    %c0_7 = arith.constant 0 : index
    %6 = vector.load %arg3[%c0_5, %c0_6, %c0_7] : memref<1x1x8xf32, #tpu.memory_space<vmem>>, vector<1x1x8xf32>
    %7 = vector.shape_cast %6 : vector<1x1x8xf32> to vector<1x8xf32>
    %8 = vector.extract_strided_slice %1 {offsets = [0, 0], sizes = [8, 8], strides = [1, 1]} : vector<8x32xf32> to vector<8x8xf32>
    %9 = vector.extract_strided_slice %4 {offsets = [0, 0], sizes = [8, 8], strides = [1, 1]} : vector<8x32xf32> to vector<8x8xf32>
    %10 = vector.extract_strided_slice %5 {offsets = [0, 0], sizes = [8, 8], strides = [1, 1]} : vector<8x32xf32> to vector<8x8xf32>
    %cst = arith.constant dense<0.000000e+00> : vector<8x8xf32>
    %11 = tpu.matmul %8, %9, %cst {dimension_numbers = #tpu.dot_dimension_numbers<[1], [1], [0], [0], [0, 0, 1, 0], [], []>} : vector<8x8xf32>, vector<8x8xf32>, vector<8x8xf32> -> vector<8x8xf32>
    %12 = vector.broadcast %7 : vector<1x8xf32> to vector<8x8xf32>
    %13 = arith.addf %11, %12 : vector<8x8xf32>
    %cst_8 = arith.constant dense<0xFF800000> : vector<8xf32>
    %14 = vector.multi_reduction <maximumf>, %13, %cst_8 [1] : vector<8x8xf32> to vector<8xf32>
    %15 = vector.shape_cast %14 : vector<8xf32> to vector<8x1xf32>
    %16 = vector.broadcast %15 : vector<8x1xf32> to vector<8x8xf32>
    %17 = arith.subf %13, %16 : vector<8x8xf32>
    %18 = math.exp %17 : vector<8x8xf32>
    %cst_9 = arith.constant dense<0.000000e+00> : vector<8xf32>
    %19 = vector.multi_reduction <add>, %18, %cst_9 [1] : vector<8x8xf32> to vector<8xf32>
    %20 = vector.shape_cast %19 : vector<8xf32> to vector<8x1xf32>
    %21 = tpu.reciprocal %20 {approx = true} : vector<8x1xf32> -> vector<8x1xf32>
    %22 = vector.broadcast %21 : vector<8x1xf32> to vector<8x8xf32>
    %23 = arith.mulf %18, %22 : vector<8x8xf32>
    %cst_10 = arith.constant dense<0.000000e+00> : vector<8x8xf32>
    %24 = tpu.matmul %23, %10, %cst_10 {dimension_numbers = #tpu.dot_dimension_numbers<[1], [0], [0], [1], [0, 0, 1, 1], [], []>} : vector<8x8xf32>, vector<8x8xf32>, vector<8x8xf32> -> vector<8x8xf32>
    %25 = vector.extract_strided_slice %1 {offsets = [0, 8], sizes = [8, 8], strides = [1, 1]} : vector<8x32xf32> to vector<8x8xf32>
    %26 = vector.extract_strided_slice %4 {offsets = [0, 8], sizes = [8, 8], strides = [1, 1]} : vector<8x32xf32> to vector<8x8xf32>
    %27 = vector.extract_strided_slice %5 {offsets = [0, 8], sizes = [8, 8], strides = [1, 1]} : vector<8x32xf32> to vector<8x8xf32>
    %cst_11 = arith.constant dense<0.000000e+00> : vector<8x8xf32>
    %28 = tpu.matmul %25, %26, %cst_11 {dimension_numbers = #tpu.dot_dimension_numbers<[1], [1], [0], [0], [0, 0, 1, 0], [], []>} : vector<8x8xf32>, vector<8x8xf32>, vector<8x8xf32> -> vector<8x8xf32>
    %29 = vector.broadcast %7 : vector<1x8xf32> to vector<8x8xf32>
    %30 = arith.addf %28, %29 : vector<8x8xf32>
    %cst_12 = arith.constant dense<0xFF800000> : vector<8xf32>
    %31 = vector.multi_reduction <maximumf>, %30, %cst_12 [1] : vector<8x8xf32> to vector<8xf32>
    %32 = vector.shape_cast %31 : vector<8xf32> to vector<8x1xf32>
    %33 = vector.broadcast %32 : vector<8x1xf32> to vector<8x8xf32>
    %34 = arith.subf %30, %33 : vector<8x8xf32>
    %35 = math.exp %34 : vector<8x8xf32>
    %cst_13 = arith.constant dense<0.000000e+00> : vector<8xf32>
    %36 = vector.multi_reduction <add>, %35, %cst_13 [1] : vector<8x8xf32> to vector<8xf32>
    %37 = vector.shape_cast %36 : vector<8xf32> to vector<8x1xf32>
    %38 = tpu.reciprocal %37 {approx = true} : vector<8x1xf32> -> vector<8x1xf32>
    %39 = vector.broadcast %38 : vector<8x1xf32> to vector<8x8xf32>
    %40 = arith.mulf %35, %39 : vector<8x8xf32>
    %cst_14 = arith.constant dense<0.000000e+00> : vector<8x8xf32>
    %41 = tpu.matmul %40, %27, %cst_14 {dimension_numbers = #tpu.dot_dimension_numbers<[1], [0], [0], [1], [0, 0, 1, 1], [], []>} : vector<8x8xf32>, vector<8x8xf32>, vector<8x8xf32> -> vector<8x8xf32>
    %42 = arith.addf %23, %40 : vector<8x8xf32>
    %43 = vector.extract_strided_slice %1 {offsets = [0, 16], sizes = [8, 8], strides = [1, 1]} : vector<8x32xf32> to vector<8x8xf32>
    %44 = vector.extract_strided_slice %4 {offsets = [0, 16], sizes = [8, 8], strides = [1, 1]} : vector<8x32xf32> to vector<8x8xf32>
    %45 = vector.extract_strided_slice %5 {offsets = [0, 16], sizes = [8, 8], strides = [1, 1]} : vector<8x32xf32> to vector<8x8xf32>
    %cst_15 = arith.constant dense<0.000000e+00> : vector<8x8xf32>
    %46 = tpu.matmul %43, %44, %cst_15 {dimension_numbers = #tpu.dot_dimension_numbers<[1], [1], [0], [0], [0, 0, 1, 0], [], []>} : vector<8x8xf32>, vector<8x8xf32>, vector<8x8xf32> -> vector<8x8xf32>
    %47 = vector.broadcast %7 : vector<1x8xf32> to vector<8x8xf32>
    %48 = arith.addf %46, %47 : vector<8x8xf32>
    %cst_16 = arith.constant dense<0xFF800000> : vector<8xf32>
    %49 = vector.multi_reduction <maximumf>, %48, %cst_16 [1] : vector<8x8xf32> to vector<8xf32>
    %50 = vector.shape_cast %49 : vector<8xf32> to vector<8x1xf32>
    %51 = vector.broadcast %50 : vector<8x1xf32> to vector<8x8xf32>
    %52 = arith.subf %48, %51 : vector<8x8xf32>
    %53 = math.exp %52 : vector<8x8xf32>
    %cst_17 = arith.constant dense<0.000000e+00> : vector<8xf32>
    %54 = vector.multi_reduction <add>, %53, %cst_17 [1] : vector<8x8xf32> to vector<8xf32>
    %55 = vector.shape_cast %54 : vector<8xf32> to vector<8x1xf32>
    %56 = tpu.reciprocal %55 {approx = true} : vector<8x1xf32> -> vector<8x1xf32>
    %57 = vector.broadcast %56 : vector<8x1xf32> to vector<8x8xf32>
    %58 = arith.mulf %53, %57 : vector<8x8xf32>
    %cst_18 = arith.constant dense<0.000000e+00> : vector<8x8xf32>
    %59 = tpu.matmul %58, %45, %cst_18 {dimension_numbers = #tpu.dot_dimension_numbers<[1], [0], [0], [1], [0, 0, 1, 1], [], []>} : vector<8x8xf32>, vector<8x8xf32>, vector<8x8xf32> -> vector<8x8xf32>
    %60 = arith.addf %42, %58 : vector<8x8xf32>
    %61 = vector.extract_strided_slice %1 {offsets = [0, 24], sizes = [8, 8], strides = [1, 1]} : vector<8x32xf32> to vector<8x8xf32>
    %62 = vector.extract_strided_slice %4 {offsets = [0, 24], sizes = [8, 8], strides = [1, 1]} : vector<8x32xf32> to vector<8x8xf32>
    %63 = vector.extract_strided_slice %5 {offsets = [0, 24], sizes = [8, 8], strides = [1, 1]} : vector<8x32xf32> to vector<8x8xf32>
    %cst_19 = arith.constant dense<0.000000e+00> : vector<8x8xf32>
    %64 = tpu.matmul %61, %62, %cst_19 {dimension_numbers = #tpu.dot_dimension_numbers<[1], [1], [0], [0], [0, 0, 1, 0], [], []>} : vector<8x8xf32>, vector<8x8xf32>, vector<8x8xf32> -> vector<8x8xf32>
    %65 = vector.broadcast %7 : vector<1x8xf32> to vector<8x8xf32>
    %66 = arith.addf %64, %65 : vector<8x8xf32>
    %cst_20 = arith.constant dense<0xFF800000> : vector<8xf32>
    %67 = vector.multi_reduction <maximumf>, %66, %cst_20 [1] : vector<8x8xf32> to vector<8xf32>
    %68 = vector.shape_cast %67 : vector<8xf32> to vector<8x1xf32>
    %69 = vector.broadcast %68 : vector<8x1xf32> to vector<8x8xf32>
    %70 = arith.subf %66, %69 : vector<8x8xf32>
    %71 = math.exp %70 : vector<8x8xf32>
    %cst_21 = arith.constant dense<0.000000e+00> : vector<8xf32>
    %72 = vector.multi_reduction <add>, %71, %cst_21 [1] : vector<8x8xf32> to vector<8xf32>
    %73 = vector.shape_cast %72 : vector<8xf32> to vector<8x1xf32>
    %74 = tpu.reciprocal %73 {approx = true} : vector<8x1xf32> -> vector<8x1xf32>
    %75 = vector.broadcast %74 : vector<8x1xf32> to vector<8x8xf32>
    %76 = arith.mulf %71, %75 : vector<8x8xf32>
    %cst_22 = arith.constant dense<0.000000e+00> : vector<8x8xf32>
    %77 = tpu.matmul %76, %63, %cst_22 {dimension_numbers = #tpu.dot_dimension_numbers<[1], [0], [0], [1], [0, 0, 1, 1], [], []>} : vector<8x8xf32>, vector<8x8xf32>, vector<8x8xf32> -> vector<8x8xf32>
    %78 = arith.addf %60, %76 : vector<8x8xf32>
    %79 = tpu.concatenate %24, %41, %59, %77 in 1 : vector<8x8xf32>, vector<8x8xf32>, vector<8x8xf32>, vector<8x8xf32> -> vector<8x32xf32>
    %c0_23 = arith.constant 0 : index
    %c0_24 = arith.constant 0 : index
    %c0_25 = arith.constant 0 : index
    %80 = vector.load %arg4[%c0_23, %c0_24, %c0_25] : memref<1x8x32xf32, #tpu.memory_space<vmem>>, vector<1x8x32xf32>
    %81 = vector.shape_cast %80 : vector<1x8x32xf32> to vector<8x32xf32>
    %82 = vector.shape_cast %79 : vector<8x32xf32> to vector<1x8x32xf32>
    tpu.vector_store %arg4[%c0_23, %c0_24, %c0_25], %82 {strides = array<i32>} : memref<1x8x32xf32, #tpu.memory_space<vmem>>, vector<1x8x32xf32>,
    %cst_26 = arith.constant 2.500000e-01 : f32
    %83 = vector.broadcast %cst_26 : f32 to vector<8x8xf32>
    %84 = arith.mulf %78, %83 : vector<8x8xf32>
    %c0_27 = arith.constant 0 : index
    %c0_28 = arith.constant 0 : index
    %c0_29 = arith.constant 0 : index
    %85 = vector.load %arg5[%c0_27, %c0_28, %c0_29] : memref<1x8x8xf32, #tpu.memory_space<vmem>>, vector<1x8x8xf32>
    %86 = vector.shape_cast %85 : vector<1x8x8xf32> to vector<8x8xf32>
    %87 = vector.shape_cast %84 : vector<8x8xf32> to vector<1x8x8xf32>
    tpu.vector_store %arg5[%c0_27, %c0_28, %c0_29], %87 {strides = array<i32>} : memref<1x8x8xf32, #tpu.memory_space<vmem>>, vector<1x8x8xf32>,
    return
  }
  func.func @transform_0(%arg0: i32) -> (i32, i32, i32) {
    %c0_i32 = arith.constant 0 : i32
    %c0_i32_0 = arith.constant 0 : i32
    %c0_i32_1 = arith.constant 0 : i32
    return %arg0, %c0_i32, %c0_i32_0 : i32, i32, i32
  }
  func.func @transform_1(%arg0: i32) -> (i32, i32, i32) {
    %c0_i32 = arith.constant 0 : i32
    %c0_i32_0 = arith.constant 0 : i32
    %c0_i32_1 = arith.constant 0 : i32
    return %arg0, %c0_i32, %c0_i32_0 : i32, i32, i32
  }
  func.func @transform_2(%arg0: i32) -> (i32, i32, i32) {
    %c0_i32 = arith.constant 0 : i32
    %c0_i32_0 = arith.constant 0 : i32
    %c0_i32_1 = arith.constant 0 : i32
    return %arg0, %c0_i32, %c0_i32_0 : i32, i32, i32
  }
  func.func @transform_3(%arg0: i32) -> (i32, i32, i32) {
    %c0_i32 = arith.constant 0 : i32
    %c0_i32_0 = arith.constant 0 : i32
    %c0_i32_1 = arith.constant 0 : i32
    return %arg0, %c0_i32, %c0_i32_0 : i32, i32, i32
  }
  func.func @transform_4(%arg0: i32) -> (i32, i32, i32) {
    %c0_i32 = arith.constant 0 : i32
    %c0_i32_0 = arith.constant 0 : i32
    %c0_i32_1 = arith.constant 0 : i32
    return %arg0, %c0_i32, %c0_i32_0 : i32, i32, i32
  }
}

module attributes {stable_mosaic.version = 11 : i64} {
  func.func @_ffn_kernel(%arg0: i32, %arg1: i32, %arg2: memref<16x32xf32, #tpu.memory_space<vmem>>, %arg3: memref<32x64xf32, #tpu.memory_space<vmem>>, %arg4: memref<1x64xf32, #tpu.memory_space<vmem>>, %arg5: memref<64x32xf32, #tpu.memory_space<vmem>>, %arg6: memref<1x32xf32, #tpu.memory_space<vmem>>, %arg7: memref<1x32xf32, #tpu.memory_space<vmem>>, %arg8: memref<1x32xf32, #tpu.memory_space<vmem>>, %arg9: memref<16x32xf32, #tpu.memory_space<vmem>>, %arg10: memref<16x32xf32, #tpu.memory_space<vmem>>) attributes {dimension_semantics = [#tpu.dimension_semantics<parallel>, #tpu.dimension_semantics<arbitrary>], iteration_bounds = array<i64: 1, 1>, scalar_prefetch = 0 : i64, scratch_operands = 1 : i64, tpu.core_type = #tpu.core_type<tc>, window_params = [{transform_indices = @transform_0, window_bounds = array<i64: 16, 32>}, {transform_indices = @transform_1, window_bounds = array<i64: 32, 64>}, {transform_indices = @transform_2, window_bounds = array<i64: 1, 64>}, {transform_indices = @transform_3, window_bounds = array<i64: 64, 32>}, {pipeline_mode = #tpu.pipeline_mode<synchronous>, transform_indices = @transform_4, window_bounds = array<i64: 1, 32>}, {pipeline_mode = #tpu.pipeline_mode<synchronous>, transform_indices = @transform_5, window_bounds = array<i64: 1, 32>}, {pipeline_mode = #tpu.pipeline_mode<synchronous>, transform_indices = @transform_6, window_bounds = array<i64: 1, 32>}, {transform_indices = @transform_7, window_bounds = array<i64: 16, 32>}]} {
    %c0_i32 = arith.constant 0 : i32
    %0 = arith.cmpi eq, %arg1, %c0_i32 : i32
    %1 = arith.extui %0 : i1 to i32
    %c0_i32_0 = arith.constant 0 : i32
    %2 = arith.cmpi ne, %1, %c0_i32_0 : i32
    scf.if %2 {
      %cst_16 = arith.constant 0.000000e+00 : f32
      %19 = vector.broadcast %cst_16 : f32 to vector<16x32xf32>
      %c0_17 = arith.constant 0 : index
      %c0_18 = arith.constant 0 : index
      %20 = vector.load %arg10[%c0_17, %c0_18] : memref<16x32xf32, #tpu.memory_space<vmem>>, vector<16x32xf32>
      tpu.vector_store %arg10[%c0_17, %c0_18], %19 {strides = array<i32>} : memref<16x32xf32, #tpu.memory_space<vmem>>, vector<16x32xf32>,
    } else {
    }
    %c0 = arith.constant 0 : index
    %c0_1 = arith.constant 0 : index
    %3 = vector.load %arg2[%c0, %c0_1] : memref<16x32xf32, #tpu.memory_space<vmem>>, vector<16x32xf32>
    %c0_2 = arith.constant 0 : index
    %c0_3 = arith.constant 0 : index
    %4 = vector.load %arg3[%c0_2, %c0_3] : memref<32x64xf32, #tpu.memory_space<vmem>>, vector<32x64xf32>
    %cst = arith.constant dense<0.000000e+00> : vector<16x64xf32>
    %5 = tpu.matmul %3, %4, %cst {dimension_numbers = #tpu.dot_dimension_numbers<[1], [0], [0], [1], [0, 0, 1, 1], [], []>} : vector<16x32xf32>, vector<32x64xf32>, vector<16x64xf32> -> vector<16x64xf32>
    %c0_4 = arith.constant 0 : index
    %c0_5 = arith.constant 0 : index
    %6 = vector.load %arg4[%c0_4, %c0_5] : memref<1x64xf32, #tpu.memory_space<vmem>>, vector<1x64xf32>
    %7 = vector.broadcast %6 : vector<1x64xf32> to vector<16x64xf32>
    %8 = arith.addf %5, %7 : vector<16x64xf32>
    %cst_6 = arith.constant 0.000000e+00 : f32
    %9 = vector.broadcast %cst_6 : f32 to vector<16x64xf32>
    %10 = arith.maximumf %8, %9 : vector<16x64xf32>
    %c0_7 = arith.constant 0 : index
    %c0_8 = arith.constant 0 : index
    %11 = vector.load %arg10[%c0_7, %c0_8] : memref<16x32xf32, #tpu.memory_space<vmem>>, vector<16x32xf32>
    %c0_9 = arith.constant 0 : index
    %c0_10 = arith.constant 0 : index
    %12 = vector.load %arg5[%c0_9, %c0_10] : memref<64x32xf32, #tpu.memory_space<vmem>>, vector<64x32xf32>
    %cst_11 = arith.constant dense<0.000000e+00> : vector<16x32xf32>
    %13 = tpu.matmul %10, %12, %cst_11 {dimension_numbers = #tpu.dot_dimension_numbers<[1], [0], [0], [1], [0, 0, 1, 1], [], []>} : vector<16x64xf32>, vector<64x32xf32>, vector<16x32xf32> -> vector<16x32xf32>
    %14 = arith.addf %11, %13 : vector<16x32xf32>
    %c0_12 = arith.constant 0 : index
    %c0_13 = arith.constant 0 : index
    %15 = vector.load %arg10[%c0_12, %c0_13] : memref<16x32xf32, #tpu.memory_space<vmem>>, vector<16x32xf32>
    tpu.vector_store %arg10[%c0_12, %c0_13], %14 {strides = array<i32>} : memref<16x32xf32, #tpu.memory_space<vmem>>, vector<16x32xf32>,
    %c0_i32_14 = arith.constant 0 : i32
    %16 = arith.cmpi eq, %arg1, %c0_i32_14 : i32
    %17 = arith.extui %16 : i1 to i32
    %c0_i32_15 = arith.constant 0 : i32
    %18 = arith.cmpi ne, %17, %c0_i32_15 : i32
    scf.if %18 {
      %c0_16 = arith.constant 0 : index
      %c0_17 = arith.constant 0 : index
      %19 = vector.load %arg10[%c0_16, %c0_17] : memref<16x32xf32, #tpu.memory_space<vmem>>, vector<16x32xf32>
      %c0_18 = arith.constant 0 : index
      %c0_19 = arith.constant 0 : index
      %20 = vector.load %arg6[%c0_18, %c0_19] : memref<1x32xf32, #tpu.memory_space<vmem>>, vector<1x32xf32>
      %21 = vector.broadcast %20 : vector<1x32xf32> to vector<16x32xf32>
      %22 = arith.addf %19, %21 : vector<16x32xf32>
      %c0_20 = arith.constant 0 : index
      %c0_21 = arith.constant 0 : index
      %23 = vector.load %arg2[%c0_20, %c0_21] : memref<16x32xf32, #tpu.memory_space<vmem>>, vector<16x32xf32>
      %24 = arith.addf %22, %23 : vector<16x32xf32>
      %cst_22 = arith.constant dense<0.000000e+00> : vector<16xf32>
      %25 = vector.multi_reduction <add>, %24, %cst_22 [1] : vector<16x32xf32> to vector<16xf32>
      %26 = vector.shape_cast %25 : vector<16xf32> to vector<16x1xf32>
      %cst_23 = arith.constant 3.200000e+01 : f32
      %27 = vector.broadcast %cst_23 : f32 to vector<16x1xf32>
      %28 = arith.divf %26, %27 : vector<16x1xf32>
      %29 = vector.broadcast %28 : vector<16x1xf32> to vector<16x32xf32>
      %30 = arith.subf %24, %29 : vector<16x32xf32>
      %31 = arith.mulf %30, %30 : vector<16x32xf32>
      %cst_24 = arith.constant dense<0.000000e+00> : vector<16xf32>
      %32 = vector.multi_reduction <add>, %31, %cst_24 [1] : vector<16x32xf32> to vector<16xf32>
      %33 = vector.shape_cast %32 : vector<16xf32> to vector<16x1xf32>
      %cst_25 = arith.constant 3.200000e+01 : f32
      %34 = vector.broadcast %cst_25 : f32 to vector<16x1xf32>
      %35 = arith.divf %33, %34 : vector<16x1xf32>
      %36 = vector.broadcast %28 : vector<16x1xf32> to vector<16x32xf32>
      %37 = arith.subf %24, %36 : vector<16x32xf32>
      %cst_26 = arith.constant 9.99999974E-6 : f32
      %38 = vector.broadcast %cst_26 : f32 to vector<16x1xf32>
      %39 = arith.addf %35, %38 : vector<16x1xf32>
      %40 = math.rsqrt %39 : vector<16x1xf32>
      %41 = vector.broadcast %40 : vector<16x1xf32> to vector<16x32xf32>
      %42 = arith.mulf %37, %41 : vector<16x32xf32>
      %c0_27 = arith.constant 0 : index
      %c0_28 = arith.constant 0 : index
      %43 = vector.load %arg7[%c0_27, %c0_28] : memref<1x32xf32, #tpu.memory_space<vmem>>, vector<1x32xf32>
      %44 = vector.broadcast %43 : vector<1x32xf32> to vector<16x32xf32>
      %45 = arith.mulf %42, %44 : vector<16x32xf32>
      %c0_29 = arith.constant 0 : index
      %c0_30 = arith.constant 0 : index
      %46 = vector.load %arg8[%c0_29, %c0_30] : memref<1x32xf32, #tpu.memory_space<vmem>>, vector<1x32xf32>
      %47 = vector.broadcast %46 : vector<1x32xf32> to vector<16x32xf32>
      %48 = arith.addf %45, %47 : vector<16x32xf32>
      %c0_31 = arith.constant 0 : index
      %c0_32 = arith.constant 0 : index
      %49 = vector.load %arg9[%c0_31, %c0_32] : memref<16x32xf32, #tpu.memory_space<vmem>>, vector<16x32xf32>
      tpu.vector_store %arg9[%c0_31, %c0_32], %48 {strides = array<i32>} : memref<16x32xf32, #tpu.memory_space<vmem>>, vector<16x32xf32>,
    } else {
    }
    return
  }
  func.func @transform_0(%arg0: i32, %arg1: i32) -> (i32, i32) {
    %c0_i32 = arith.constant 0 : i32
    %c0_i32_0 = arith.constant 0 : i32
    return %arg0, %c0_i32 : i32, i32
  }
  func.func @transform_1(%arg0: i32, %arg1: i32) -> (i32, i32) {
    %c0_i32 = arith.constant 0 : i32
    %c0_i32_0 = arith.constant 0 : i32
    return %c0_i32, %arg1 : i32, i32
  }
  func.func @transform_2(%arg0: i32, %arg1: i32) -> (i32, i32) {
    %c0_i32 = arith.constant 0 : i32
    %c0_i32_0 = arith.constant 0 : i32
    return %c0_i32, %arg1 : i32, i32
  }
  func.func @transform_3(%arg0: i32, %arg1: i32) -> (i32, i32) {
    %c0_i32 = arith.constant 0 : i32
    %c0_i32_0 = arith.constant 0 : i32
    return %arg1, %c0_i32 : i32, i32
  }
  func.func @transform_4(%arg0: i32, %arg1: i32) -> (i32, i32) {
    %c0_i32 = arith.constant 0 : i32
    %c0_i32_0 = arith.constant 0 : i32
    %c0_i32_1 = arith.constant 0 : i32
    return %c0_i32, %c0_i32_0 : i32, i32
  }
  func.func @transform_5(%arg0: i32, %arg1: i32) -> (i32, i32) {
    %c0_i32 = arith.constant 0 : i32
    %c0_i32_0 = arith.constant 0 : i32
    %c0_i32_1 = arith.constant 0 : i32
    return %c0_i32, %c0_i32_0 : i32, i32
  }
  func.func @transform_6(%arg0: i32, %arg1: i32) -> (i32, i32) {
    %c0_i32 = arith.constant 0 : i32
    %c0_i32_0 = arith.constant 0 : i32
    %c0_i32_1 = arith.constant 0 : i32
    return %c0_i32, %c0_i32_0 : i32, i32
  }
  func.func @transform_7(%arg0: i32, %arg1: i32) -> (i32, i32) {
    %c0_i32 = arith.constant 0 : i32
    %c0_i32_0 = arith.constant 0 : i32
    return %arg0, %c0_i32 : i32, i32
  }
}

module attributes {stable_mosaic.version = 11 : i64} {
  func.func @_linear_kernel(%arg0: i32, %arg1: memref<16x32xf32, #tpu.memory_space<vmem>>, %arg2: memref<32x64xf32, #tpu.memory_space<vmem>>, %arg3: memref<1x64xf32, #tpu.memory_space<vmem>>, %arg4: memref<16x64xf32, #tpu.memory_space<vmem>>) attributes {dimension_semantics = [#tpu.dimension_semantics<parallel>], iteration_bounds = array<i64: 1>, scalar_prefetch = 0 : i64, scratch_operands = 0 : i64, tpu.core_type = #tpu.core_type<tc>, window_params = [{transform_indices = @transform_0, window_bounds = array<i64: 16, 32>}, {pipeline_mode = #tpu.pipeline_mode<synchronous>, transform_indices = @transform_1, window_bounds = array<i64: 32, 64>}, {pipeline_mode = #tpu.pipeline_mode<synchronous>, transform_indices = @transform_2, window_bounds = array<i64: 1, 64>}, {transform_indices = @transform_3, window_bounds = array<i64: 16, 64>}]} {
    %c0 = arith.constant 0 : index
    %c0_0 = arith.constant 0 : index
    %0 = vector.load %arg1[%c0, %c0_0] : memref<16x32xf32, #tpu.memory_space<vmem>>, vector<16x32xf32>
    %c0_1 = arith.constant 0 : index
    %c0_2 = arith.constant 0 : index
    %1 = vector.load %arg2[%c0_1, %c0_2] : memref<32x64xf32, #tpu.memory_space<vmem>>, vector<32x64xf32>
    %cst = arith.constant dense<0.000000e+00> : vector<16x64xf32>
    %2 = tpu.matmul %0, %1, %cst {dimension_numbers = #tpu.dot_dimension_numbers<[1], [0], [0], [1], [0, 0, 1, 1], [], []>} : vector<16x32xf32>, vector<32x64xf32>, vector<16x64xf32> -> vector<16x64xf32>
    %c0_3 = arith.constant 0 : index
    %c0_4 = arith.constant 0 : index
    %3 = vector.load %arg3[%c0_3, %c0_4] : memref<1x64xf32, #tpu.memory_space<vmem>>, vector<1x64xf32>
    %4 = vector.broadcast %3 : vector<1x64xf32> to vector<16x64xf32>
    %5 = arith.addf %2, %4 : vector<16x64xf32>
    %c0_5 = arith.constant 0 : index
    %c0_6 = arith.constant 0 : index
    %6 = vector.load %arg4[%c0_5, %c0_6] : memref<16x64xf32, #tpu.memory_space<vmem>>, vector<16x64xf32>
    tpu.vector_store %arg4[%c0_5, %c0_6], %5 {strides = array<i32>} : memref<16x64xf32, #tpu.memory_space<vmem>>, vector<16x64xf32>,
    return
  }
  func.func @transform_0(%arg0: i32) -> (i32, i32) {
    %c0_i32 = arith.constant 0 : i32
    %c0_i32_0 = arith.constant 0 : i32
    return %arg0, %c0_i32 : i32, i32
  }
  func.func @transform_1(%arg0: i32) -> (i32, i32) {
    %c0_i32 = arith.constant 0 : i32
    %c0_i32_0 = arith.constant 0 : i32
    %c0_i32_1 = arith.constant 0 : i32
    return %c0_i32, %c0_i32_0 : i32, i32
  }
  func.func @transform_2(%arg0: i32) -> (i32, i32) {
    %c0_i32 = arith.constant 0 : i32
    %c0_i32_0 = arith.constant 0 : i32
    %c0_i32_1 = arith.constant 0 : i32
    return %c0_i32, %c0_i32_0 : i32, i32
  }
  func.func @transform_3(%arg0: i32) -> (i32, i32) {
    %c0_i32 = arith.constant 0 : i32
    %c0_i32_0 = arith.constant 0 : i32
    return %arg0, %c0_i32 : i32, i32
  }
}

</mosaic_0001>

<bundles_post_ra>
// kernel: decoder_layer_forward.8
= control target key start
LH: loop header
LB: loop body
LE: loop exit
PB: predicated region body
PF: predicated region fallthrough
CT: control target
= control target key end

     0   :  { %vm27_vm0 = vcmask 261120   ;;  %vm109_vm1 = vcmask 785408   ;;  %s185_s1 = inlined_call_operand.vmem [shape: f32[32,96], index: 1, kind: input, shape index: {}]   ;;  %s186_s0 = inlined_call_operand.vmem [shape: f32[16,32], index: 0, kind: input, shape index: {}]   ;;  %s187_s2 = inlined_call_operand.vmem [shape: f32[1,96], index: 2, kind: input, shape index: {}]   ;;  %s188_s3 = inlined_call_operand.vmem [shape: f32[16,96], index: 3, kind: output, shape index: {}]  }
   0x1   :  { %v19_v0 = vld [vmem:[%s185_s1 + $0x18] sm:$0xff]  ;;  %v18_v1 = vld [vmem:[%s185_s1 + $0x10] sm:$0xff]  ;;  %v14_v2 = vld [vmem:[%s186_s0] sm:$0xff] }
   0x2   :  { %125 = vmatprep.subr.mxu0 %v19_v0  ;;  %v17_v3 = vld [vmem:[%s185_s1 + $0x8] sm:$0xff]  ;;  %133 = vmatprep.mubr.msk.f32.mxu0 %vm27_vm0, %v14_v2  ;;  %v16_v4 = vld [vmem:[%s185_s1] sm:$0xff] }
   0x3   :  { %126 = vmatpush3.msra.mxu0 %v19_v0  ;;  %v15_v5 = vld [vmem:[%s186_s0 + $0x8] sm:$0xff]  ;;  %v116_v6 = vld [vmem:[%s187_s2] ss:$0 sm:$0xff] }
   0x4   :  { %127 = vmatprep.subr.mxu0 %v18_v1 }
   0x5   :  { %128 = vmatpush3.msra.mxu0 %v18_v1 }
   0x6   :  { %129 = vmatprep.subr.mxu0 %v17_v3 }
   0x7   :  { %130 = vmatpush3.msra.mxu0 %v17_v3 }
   0x8   :  { %131 = vmatprep.subr.mxu0 %v16_v4 }
   0x9   :  { %132 = vmatpush3.msra.mxu0 %v16_v4 }
   0xa   :  { %134 = vmatmul.mubr.msk.f32.vlgmr.msra.gmra.mxu0 %vm27_vm0, %v15_v5 }
  0xca   :  { %v135_v7 = vpop.f32.mrf.mxu0 }
  0xcb   :  { %v106_v8 = vadd.f32 %v135_v7, %v116_v6 }
  0xcc   :  { %v100_v9 = vpop.f32.mrf.mxu0 }
  0xcd   :  { %111 = vst.msk [vmem:[%s188_s3 + $0x8] sm:$0xff] %vm109_vm1, %v106_v8  ;;  %v101_v10 = vadd.f32 %v116_v6, %v100_v9 }
  0xcf   :  { %110 = vst.msk [vmem:[%s188_s3] sm:$0xff] %vm109_vm1, %v101_v10 }

// kernel: decoder_layer_forward.10
= control target key start
LH: loop header
LB: loop body
LE: loop exit
PB: predicated region body
PF: predicated region fallthrough
CT: control target
= control target key end

     0   :  { %vm36_vm0 = vcmask 261120   ;;  %s281_s1 = inlined_call_operand.vmem [shape: f32[32,32], index: 1, kind: input, shape index: {}]   ;;  %s282_s0 = inlined_call_operand.vmem [shape: f32[16,32], index: 0, kind: input, shape index: {}]   ;;  %s283_s2 = inlined_call_operand.vmem [shape: f32[1,32], index: 2, kind: input, shape index: {}]   ;;  %s284_s3 = inlined_call_operand.vmem [shape: f32[16,32], index: 3, kind: input, shape index: {}]   ;;  %s285_s4 = inlined_call_operand.vmem [shape: f32[1,32], index: 4, kind: input, shape index: {}]   ;;  %s286_s5 = inlined_call_operand.vmem [shape: f32[1,32], index: 5, kind: input, shape index: {}]   ;;  %s287_s6 = inlined_call_operand.vmem [shape: f32[16,32], index: 6, kind: output, shape index: {}]  }
   0x1   :  { %v28_v0 = vld [vmem:[%s281_s1 + $0x18] sm:$0xff]  ;;  %v27_v1 = vld [vmem:[%s281_s1 + $0x10] sm:$0xff]  ;;  %v23_v2 = vld [vmem:[%s282_s0] sm:$0xff] }
   0x2   :  { %184 = vmatprep.subr.mxu0 %v28_v0  ;;  %v26_v3 = vld [vmem:[%s281_s1 + $0x8] sm:$0xff]  ;;  %192 = vmatprep.mubr.msk.f32.mxu0 %vm36_vm0, %v23_v2  ;;  %v25_v4 = vld [vmem:[%s281_s1] sm:$0xff] }
   0x3   :  { %185 = vmatpush3.msra.mxu0 %v28_v0  ;;  %v24_v5 = vld [vmem:[%s282_s0 + $0x8] sm:$0xff]  ;;  %v173_v7 = vld [vmem:[%s283_s2] ss:$0 sm:$0xff] }
   0x4   :  { %186 = vmatprep.subr.mxu0 %v27_v1  ;;  %v118_v9 = vld [vmem:[%s284_s3] sm:$0xff]  ;;  %v119_v12 = vld [vmem:[%s284_s3 + $0x8] sm:$0xff] }
   0x5   :  { %187 = vmatpush3.msra.mxu0 %v27_v1  ;;  %v176_v34 = vld [vmem:[%s285_s4] ss:$0 sm:$0xff] }
   0x6   :  { %188 = vmatprep.subr.mxu0 %v26_v3  ;;  %v177_v36 = vld [vmem:[%s286_s5] ss:$0 sm:$0xff] }
   0x7   :  { %189 = vmatpush3.msra.mxu0 %v26_v3 }
   0x8   :  { %190 = vmatprep.subr.mxu0 %v25_v4 }
   0x9   :  { %191 = vmatpush3.msra.mxu0 %v25_v4 }
   0xa   :  { %193 = vmatmul.mubr.msk.f32.vlgmr.msra.gmra.mxu0 %vm36_vm0, %v24_v5 }
  0xca   :  { %v194_v6 = vpop.f32.mrf.mxu0 }
  0xcb   :  { %v115_v10 = vadd.f32 %v194_v6, %v173_v7 }
  0xcc   :  { %v109_v8 = vpop.f32.mrf.mxu0 }
  0xcd   :  { %v110_v11 = vadd.f32 %v173_v7, %v109_v8  ;;  %v121_v15 = vadd.f32 %v119_v12, %v115_v10 }
  0xcf   :  { %v120_v13 = vadd.f32 %v118_v9, %v110_v11  ;;  %v125_v16 = vsel %vm36_vm0, %v121_v15, 0.0 }
  0xd1   :  { %v122_v14 = vsel %vm36_vm0, %v120_v13, 0.0 }
  0xd2   :  { %123 = vadd.xlane.f32.xlu0 %v122_v14 }
  0xd6   :  { %126 = vadd.xlane.f32.xlu0 %v125_v16 }
 0x15b   :  { %v124_v17 = vpop.xlane.xlu0 %123 }
 0x15c   :  { %v129_v18 = vmul.f32 0.03125, %v124_v17 }
 0x15e   :  { %v131_v19 = vsub.f32 %v120_v13, %v129_v18 }
 0x15f   :  { %v127_v20 = vpop.xlane.xlu0 %126 }
 0x160   :  { %v130_v21 = vmul.f32 0.03125, %v127_v20  ;;  %v133_v22 = vmul.f32 %v131_v19, %v131_v19 }
 0x162   :  { %v132_v23 = vsub.f32 %v121_v15, %v130_v21  ;;  %v135_v24 = vsel %vm36_vm0, %v133_v22, 0.0 }
 0x163   :  { %136 = vadd.xlane.f32.xlu1 %v135_v24 }
 0x164   :  { %v134_v25 = vmul.f32 %v132_v23, %v132_v23 }
 0x166   :  { %v138_v26 = vsel %vm36_vm0, %v134_v25, 0.0 }
 0x167   :  { %139 = vadd.xlane.f32.xlu1 %v138_v26 }
 0x1ec   :  { %v137_v27 = vpop.xlane.xlu1 %136 }
 0x1ed   :  { %v141_v28 = vmul.f32 0.03125, %v137_v27 }
 0x1ef   :  { %v143_v29 = vadd.f32 1e-05, %v141_v28 }
 0x1f0   :  { %v140_v30 = vpop.xlane.xlu1 %139 }
 0x1f1   :  { %195 = vrsqrt.f32 %v143_v29  ;;  %v142_v31 = vmul.f32 0.03125, %v140_v30 }
 0x1f3   :  { %v144_v32 = vadd.f32 1e-05, %v142_v31 }
 0x1f5   :  { %197 = vrsqrt.f32 %v144_v32 }
 0x1fe   :  { %v196_v33 = vpop.eup %195 }
 0x1ff   :  { %v147_v35 = vmul.f32 %v196_v33, %v131_v19 }
 0x201   :  { %v156_v37 = vmul.f32 %v176_v34, %v147_v35 }
 0x202   :  { %v198_v38 = vpop.eup %197 }
 0x203   :  { %v165_v39 = vadd.f32 %v177_v36, %v156_v37  ;;  %v148_v40 = vmul.f32 %v198_v38, %v132_v23 }
 0x205   :  { %167 = vst.msk [vmem:[%s287_s6] sm:$0xff] %vm36_vm0, %v165_v39  ;;  %v157_v41 = vmul.f32 %v176_v34, %v148_v40 }
 0x207   :  { %v166_v42 = vadd.f32 %v177_v36, %v157_v41 }
 0x209   :  { %168 = vst.msk [vmem:[%s287_s6 + $0x8] sm:$0xff] %vm36_vm0, %v166_v42 }

// kernel: decoder_layer_forward.9
= control target key start
LH: loop header
LB: loop body
LE: loop exit
PB: predicated region body
PF: predicated region fallthrough
CT: control target
= control target key end

     0   :  { %s1029_s9 = smov 0   ;;  %s1118_s0 = inlined_call_operand.vmem [shape: f32[2,8,96], index: 0, kind: input, shape index: {}]   ;;  %s1119_s1 = inlined_call_operand.vmem [shape: f32[8,8], index: 1, kind: input, shape index: {}]   ;;  %s1120_s2 = inlined_call_operand.vmem [shape: f32[2,8,32], index: 2, kind: output, shape index: {}]  }
   0x1 LB: > { %s873_s10 = sadd.s32 4294967295, %s996_s9   ;;  %p877_p0 = scmp.ge.s32.totalorder %s996_s9, 1  ;;  %s996_s9 = sphi %s1029_s9, %s12_s9  }
   0x2   : > { %p111_p1 = scmp.lt.s32.totalorder %s996_s9, 3 }
   0x4   : > { %p112_p2 = pnand %p877_p0, %p111_p1 }
   0x5   : > { %p131_p3 = scmp.lt.s32.totalorder (!%p112_p2), %s873_s10, 1  ;;  %s1000_s15 = smov (!%p112_p2), 96  }
   0x6   : > { %115 = sbr.rel (%p112_p2) target bundleno = 1469 (0x5bd), region = 28  ;;  %s1001_s16 = smov (!%p112_p2), 64  }
   0x7   : > { %s1002_s17 = smov (!%p112_p2), 88   ;;  %s1003_s18 = smov (!%p112_p2), 120  }
   0x8   : > { %s1004_s19 = smov (!%p112_p2), 80   ;;  %s1005_s22 = smov (!%p112_p2), 72  }
   0x9   : > { %s1006_s23 = smov (!%p112_p2), 112   ;;  %s1007_s24 = smov (!%p112_p2), 104  }
   0xa   : > { %s1008_s25 = smov (!%p112_p2), 56   ;;  %s1009_s26 = smov (!%p112_p2), 40  }
   0xb   : > { %v998_v0 = vmov 0.0   ;;  %vm999_vm0 = vmmov 0   ;;  %s1122_s10 = smov (!%p131_p3, %s873_s10), 1  ;;  %vm144_vm1 = vcmask 64512   ;;  %v140_v3 = vld [vmem:[%s1119_s1] sm:$0xff]  ;;  %s1010_s27 = smov 48  }
   0xc   : > { %910 = vmatprep.subr.mxu0 %v998_v0  ;;  %912 = vmatprep.mubr.msk.f32.mxu0 %vm999_vm0, %v998_v0  ;;  %s878_s11 = sshll.u32 %s1122_s10, 3  ;;  %s1011_s28 = smov 8   ;;  %vm814_vm2 = vcmask 130048   ;;  %vm816_vm3 = vcmask 195584   ;;  %vm818_vm4 = vcmask 261120  }
   0xd   : > { %915 = vmatprep.subr.mxu1 %v998_v0  ;;  %917 = vmatprep.mubr.msk.f32.mxu1 %vm999_vm0, %v998_v0  ;;  %s134_s14 = scalar_lea.vmem %s1118_s0, %s878_s11  ;;  %s1012_s29 = smov 16  }
   0xe   : > { %v1051_v1 = vld [vmem:[%s134_s14] sm:$0xff]  ;;  %s1013_s30 = smov 24   ;;  %s138_s5 = scalar_lea.vmem %s1120_s2, %s878_s11 }
   0xf   : > { %142 = vrot.lane.b32.xlu0 %v1051_v1, %s1000_s15  ;;  %230 = vrot.lane.b32.xlu1 %v1051_v1, %s1001_s16 }
  0x13   : > { %308 = vrot.lane.b32.xlu1 %v1051_v1, %s1002_s17 }
  0x17   : > { %306 = vrot.lane.b32.xlu1 %v1051_v1, %s1003_s18 }
  0x1b   : > { %473 = vrot.lane.b32.xlu1 %v1051_v1, %s1004_s19 }
  0x81   : > { %v143_v2 = vpop.permute.xlu0 %142  ;;  %v231_v8 = vpop.permute.xlu1 %230 }
  0x82   : > { %911 = vmatpush3.xpose.msk.msra.mxu0 %vm144_vm1, %v143_v2  ;;  %916 = vmatpush3.msra.mxu1 %v231_v8 }
  0x83   : > { %925 = vmatprep.subr.mxu0 %v998_v0  ;;  %920 = vmatprep.subr.mxu1 %v998_v0 }
  0x85   : > { %913 = vmatmul.mubr.msk.f32.vlgmr.msra.gmra.mxu0 %vm144_vm1, %v1051_v1  ;;  %v309_v14 = vpop.permute.xlu1 %308 }
  0x86   : > { %927 = vmatprep.mubr.msk.f32.mxu0 %vm999_vm0, %v998_v0 }
  0x89   : > { %v307_v15 = vpop.permute.xlu1 %306 }
  0x8d   : > { %v474_v16 = vpop.permute.xlu1 %473 }
 0x145   : > { %v215_v4 = vpop.f32.mrf.mxu0 }
 0x146   : > { %v216_v5 = vadd.f32 %v215_v4, %v140_v3 }
 0x147   : > { %v914_v6 = vpop.f32.mrf.mxu0 }
 0x148   : > { %v219_v7 = vsel %vm144_vm1, %v216_v5, -inf }
 0x149   : > { %220 = vmax.xlane.f32.xlu0 %v219_v7 }
 0x15f   : > { %638 = vrot.lane.b32.xlu0 %v1051_v1, %s1005_s22 }
 0x1d2   : > { %v221_v9 = vpop.xlane.xlu0 %220 }
 0x1d3   : > { %v222_v10 = vsub.f32 %v216_v5, %v221_v9 }
 0x1d5   : > { %v223_v11 = vmul.f32 1.442695, %v222_v10 }
 0x1d6   : > { %v639_v21 = vpop.permute.xlu0 %638 }
 0x1d7   : > { %974 = vpow2.f32 %v223_v11 }
 0x1e4   : > { %v975_v12 = vpop.eup %974 }
 0x1e5   : > { %v225_v13 = vsel %vm144_vm1, %v975_v12, 0.0 }
 0x1e6   : > { %226 = vadd.xlane.f32.xlu1 %v225_v13 }
 0x1f7   : > { %471 = vrot.lane.b32.xlu1 %v1051_v1, %s1006_s23 }
 0x1fb   : > { %636 = vrot.lane.b32.xlu1 %v1051_v1, %s1007_s24 }
 0x26f   : > { %v227_v17 = vpop.xlane.xlu1 %226 }
 0x270   : > { %976 = vrcp.f32 %v227_v17 }
 0x273   : > { %v472_v20 = vpop.permute.xlu1 %471 }
 0x277   : > { %v637_v22 = vpop.permute.xlu1 %636 }
 0x27d   : > { %v977_v18 = vpop.eup %976 }
 0x27e   : > { %v229_v19 = vmul.f32 %v977_v18, %v975_v12 }
 0x280   : > { %918 = vmatmul.mubr.msk.f32.vlgmr.msra.gmra.mxu1 %vm144_vm1, %v229_v19 }
 0x281   : > { %921 = vmatpush3.xpose.msk.msra.mxu1 %vm144_vm1, %v309_v14  ;;  %922 = vmatprep.mubr.msk.f32.mxu1 %vm999_vm0, %v998_v0 }
 0x282   : > { %930 = vmatprep.subr.mxu1 %v998_v0 }
 0x284   : > { %923 = vmatmul.mubr.msk.f32.vlgmr.msra.gmra.mxu1 %vm144_vm1, %v307_v15 }
 0x285   : > { %931 = vmatpush3.xpose.msk.msra.mxu1 %vm144_vm1, %v474_v16  ;;  %932 = vmatprep.mubr.msk.f32.mxu1 %vm999_vm0, %v998_v0 }
 0x286   : > { %940 = vmatprep.subr.mxu1 %v998_v0 }
 0x288   : > { %933 = vmatmul.mubr.msk.f32.vlgmr.msra.gmra.mxu1 %vm144_vm1, %v472_v20 }
 0x289   : > { %941 = vmatpush3.xpose.msk.msra.mxu1 %vm144_vm1, %v639_v21  ;;  %942 = vmatprep.mubr.msk.f32.mxu1 %vm999_vm0, %v998_v0 }
 0x28c   : > { %943 = vmatmul.mubr.msk.f32.vlgmr.msra.gmra.mxu1 %vm144_vm1, %v637_v22 }
 0x340   : > { %v1088_v23 = vpop.f32.mrf.mxu1 }
 0x342   : > { %v919_v24 = vpop.f32.mrf.mxu1 }
 0x344   : > { %v380_v25 = vpop.f32.mrf.mxu1 }
 0x345   : > { %v381_v26 = vadd.f32 %v380_v25, %v140_v3 }
 0x346   : > { %v924_v27 = vpop.f32.mrf.mxu1 }
 0x347   : > { %v384_v28 = vsel %vm144_vm1, %v381_v26, -inf }
 0x348   : > { %385 = vmax.xlane.f32.xlu1 %v384_v28  ;;  %v545_v29 = vpop.f32.mrf.mxu1 }
 0x349   : > { %v546_v30 = vadd.f32 %v545_v29, %v140_v3 }
 0x34a   : > { %v934_v31 = vpop.f32.mrf.mxu1 }
 0x34b   : > { %v549_v32 = vsel %vm144_vm1, %v546_v30, -inf }
 0x34c   : > { %550 = vmax.xlane.f32.xlu0 %v549_v32  ;;  %v710_v33 = vpop.f32.mrf.mxu1 }
 0x34d   : > { %v711_v34 = vadd.f32 %v710_v33, %v140_v3 }
 0x34e   : > { %v944_v35 = vpop.f32.mrf.mxu1 }
 0x34f   : > { %v714_v36 = vsel %vm144_vm1, %v711_v34, -inf }
 0x350   : > { %715 = vmax.xlane.f32.xlu1 %v714_v36 }
 0x361   : > { %395 = vrot.lane.b32.xlu1 %v1051_v1, %s1008_s25 }
 0x3d1   : > { %v386_v37 = vpop.xlane.xlu1 %385 }
 0x3d2   : > { %v387_v38 = vsub.f32 %v381_v26, %v386_v37 }
 0x3d4   : > { %v388_v39 = vmul.f32 1.442695, %v387_v38 }
 0x3d5   : > { %v551_v40 = vpop.xlane.xlu0 %550 }
 0x3d6   : > { %978 = vpow2.f32 %v388_v39  ;;  %v552_v41 = vsub.f32 %v546_v30, %v551_v40 }
 0x3d8   : > { %v553_v42 = vmul.f32 1.442695, %v552_v41 }
 0x3d9   : > { %v716_v43 = vpop.xlane.xlu1 %715 }
 0x3da   : > { %980 = vpow2.f32 %v553_v42  ;;  %v717_v44 = vsub.f32 %v711_v34, %v716_v43 }
 0x3dc   : > { %v718_v45 = vmul.f32 1.442695, %v717_v44 }
 0x3dd   : > { %v396_v46 = vpop.permute.xlu1 %395 }
 0x3de   : > { %982 = vpow2.f32 %v718_v45  ;;  %926 = vmatpush3.msra.mxu0 %v396_v46 }
 0x3df   : > { %935 = vmatprep.subr.mxu0 %v998_v0 }
 0x3e3   : > { %v979_v47 = vpop.eup %978 }
 0x3e4   : > { %v390_v48 = vsel %vm144_vm1, %v979_v47, 0.0 }
 0x3e5   : > { %391 = vadd.xlane.f32.xlu1 %v390_v48 }
 0x3e7   : > { %v981_v49 = vpop.eup %980 }
 0x3e8   : > { %v555_v50 = vsel %vm144_vm1, %v981_v49, 0.0 }
 0x3e9   : > { %556 = vadd.xlane.f32.xlu1 %v555_v50 }
 0x3eb   : > { %v983_v51 = vpop.eup %982 }
 0x3ec   : > { %v720_v52 = vsel %vm144_vm1, %v983_v51, 0.0 }
 0x3ed   : > { %721 = vadd.xlane.f32.xlu0 %v720_v52 }
 0x3fa   : > { %725 = vrot.lane.b32.xlu1 %v1051_v1, %s1009_s26 }
 0x403   : > { %560 = vrot.lane.b32.xlu0 %v1051_v1, %s1010_s27 }
 0x46e   : > { %v392_v53 = vpop.xlane.xlu1 %391 }
 0x46f   : > { %984 = vrcp.f32 %v392_v53 }
 0x472   : > { %v557_v54 = vpop.xlane.xlu1 %556 }
 0x473   : > { %986 = vrcp.f32 %v557_v54 }
 0x476   : > { %v722_v55 = vpop.xlane.xlu0 %721  ;;  %v726_v60 = vpop.permute.xlu1 %725 }
 0x477   : > { %988 = vrcp.f32 %v722_v55 }
 0x47a   : > { %v561_v57 = vpop.permute.xlu0 %560 }
 0x47c   : > { %v985_v56 = vpop.eup %984 }
 0x47d   : > { %v394_v58 = vmul.f32 %v985_v56, %v979_v47 }
 0x47f   : > { %928 = vmatmul.mubr.msk.f32.vlgmr.msra.gmra.mxu0 %vm144_vm1, %v394_v58 }
 0x480   : > { %v987_v59 = vpop.eup %986  ;;  %936 = vmatpush3.msra.mxu0 %v561_v57  ;;  %937 = vmatprep.mubr.msk.f32.mxu0 %vm999_vm0, %v998_v0 }
 0x481   : > { %945 = vmatprep.subr.mxu0 %v998_v0  ;;  %v559_v61 = vmul.f32 %v987_v59, %v981_v49 }
 0x483   : > { %938 = vmatmul.mubr.msk.f32.vlgmr.msra.gmra.mxu0 %vm144_vm1, %v559_v61 }
 0x484   : > { %v989_v62 = vpop.eup %988  ;;  %946 = vmatpush3.msra.mxu0 %v726_v60  ;;  %947 = vmatprep.mubr.msk.f32.mxu0 %vm999_vm0, %v998_v0 }
 0x485   : > { %v724_v63 = vmul.f32 %v989_v62, %v983_v51 }
 0x487   : > { %948 = vmatmul.mubr.msk.f32.vlgmr.msra.gmra.mxu0 %vm144_vm1, %v724_v63 }
 0x53f   : > { %v467_v1 = vpop.f32.mrf.mxu0 }
 0x540   : > { %802 = vrot.lane.b32.xlu1 %v467_v1, %s1011_s28 }
 0x541   : > { %v929_v2 = vpop.f32.mrf.mxu0 }
 0x543   : > { %v632_v3 = vpop.f32.mrf.mxu0 }
 0x544   : > { %806 = vrot.lane.b32.xlu0 %v632_v3, %s1012_s29 }
 0x545   : > { %v939_v4 = vpop.f32.mrf.mxu0 }
 0x547   : > { %v797_v5 = vpop.f32.mrf.mxu0 }
 0x548   : > { %810 = vrot.lane.b32.xlu1 %v797_v5, %s1013_s30 }
 0x549   : > { %v949_v6 = vpop.f32.mrf.mxu0 }
 0x5b2   : > { %v803_v7 = vpop.permute.xlu1 %802 }
 0x5b3   : > { %v813_v0 = vsel %vm144_vm1, %v1088_v23, %v803_v7 }
 0x5b6   : > { %v807_v8 = vpop.permute.xlu0 %806 }
 0x5b7   : > { %v815_v9 = vsel %vm814_vm2, %v813_v0, %v807_v8 }
 0x5ba   : > { %v811_v10 = vpop.permute.xlu1 %810 }
 0x5bb   : > { %v817_v11 = vsel %vm816_vm3, %v815_v9, %v811_v10 }
 0x5bc   : > { %819 = vst.msk [vmem:[%s138_s5] sm:$0xff] %vm818_vm4, %v817_v11 }
 0x5bd PF: > { %s12_s9 = sadd.s32 1, %s996_s9  }
 0x5be   : > { %p9_p4 = scmp.ge.s32.totalorder %s12_s9, 4  }
 0x5c0   :  { %11 = sbr.rel (!%p9_p4) target bundleno = 1 (0x1), region = 58 }

// kernel: decoder_layer_forward.11
= control target key start
LH: loop header
LB: loop body
LE: loop exit
PB: predicated region body
PF: predicated region fallthrough
CT: control target
= control target key end

     0   :  { %vm27_vm0 = vcmask 261120   ;;  %s186_s1 = inlined_call_operand.vmem [shape: f32[32,32], index: 1, kind: input, shape index: {}]   ;;  %s187_s0 = inlined_call_operand.vmem [shape: f32[16,32], index: 0, kind: input, shape index: {}]   ;;  %s188_s2 = inlined_call_operand.vmem [shape: f32[1,32], index: 2, kind: input, shape index: {}]   ;;  %s189_s3 = inlined_call_operand.vmem [shape: f32[16,32], index: 3, kind: output, shape index: {}]  }
   0x1   :  { %v19_v0 = vld [vmem:[%s186_s1 + $0x18] sm:$0xff]  ;;  %v18_v1 = vld [vmem:[%s186_s1 + $0x10] sm:$0xff]  ;;  %v14_v2 = vld [vmem:[%s187_s0] sm:$0xff] }
   0x2   :  { %124 = vmatprep.subr.mxu0 %v19_v0  ;;  %v17_v3 = vld [vmem:[%s186_s1 + $0x8] sm:$0xff]  ;;  %132 = vmatprep.mubr.msk.f32.mxu0 %vm27_vm0, %v14_v2  ;;  %v16_v4 = vld [vmem:[%s186_s1] sm:$0xff] }
   0x3   :  { %125 = vmatpush3.msra.mxu0 %v19_v0  ;;  %v15_v5 = vld [vmem:[%s187_s0 + $0x8] sm:$0xff]  ;;  %v115_v6 = vld [vmem:[%s188_s2] ss:$0 sm:$0xff] }
   0x4   :  { %126 = vmatprep.subr.mxu0 %v18_v1 }
   0x5   :  { %127 = vmatpush3.msra.mxu0 %v18_v1 }
   0x6   :  { %128 = vmatprep.subr.mxu0 %v17_v3 }
   0x7   :  { %129 = vmatpush3.msra.mxu0 %v17_v3 }
   0x8   :  { %130 = vmatprep.subr.mxu0 %v16_v4 }
   0x9   :  { %131 = vmatpush3.msra.mxu0 %v16_v4 }
   0xa   :  { %133 = vmatmul.mubr.msk.f32.vlgmr.msra.gmra.mxu0 %vm27_vm0, %v15_v5 }
  0xca   :  { %v134_v7 = vpop.f32.mrf.mxu0 }
  0xcb   :  { %v106_v8 = vadd.f32 %v134_v7, %v115_v6 }
  0xcc   :  { %v100_v9 = vpop.f32.mrf.mxu0 }
  0xcd   :  { %110 = vst.msk [vmem:[%s189_s3 + $0x8] sm:$0xff] %vm27_vm0, %v106_v8  ;;  %v101_v10 = vadd.f32 %v115_v6, %v100_v9 }
  0xcf   :  { %109 = vst.msk [vmem:[%s189_s3] sm:$0xff] %vm27_vm0, %v101_v10 }

// kernel: decoder_layer_forward.12
= control target key start
LH: loop header
LB: loop body
LE: loop exit
PB: predicated region body
PF: predicated region fallthrough
CT: control target
= control target key end

     0   :  { %vm27_vm0 = vcmask 261120   ;;  %vm109_vm1 = vcmask 523264   ;;  %s185_s1 = inlined_call_operand.vmem [shape: f32[32,64], index: 1, kind: input, shape index: {}]   ;;  %s186_s0 = inlined_call_operand.vmem [shape: f32[16,32], index: 0, kind: input, shape index: {}]   ;;  %s187_s2 = inlined_call_operand.vmem [shape: f32[1,64], index: 2, kind: input, shape index: {}]   ;;  %s188_s3 = inlined_call_operand.vmem [shape: f32[16,64], index: 3, kind: output, shape index: {}]  }
   0x1   :  { %v19_v0 = vld [vmem:[%s185_s1 + $0x18] sm:$0xff]  ;;  %v18_v1 = vld [vmem:[%s185_s1 + $0x10] sm:$0xff]  ;;  %v14_v2 = vld [vmem:[%s186_s0] sm:$0xff] }
   0x2   :  { %125 = vmatprep.subr.mxu0 %v19_v0  ;;  %v17_v3 = vld [vmem:[%s185_s1 + $0x8] sm:$0xff]  ;;  %133 = vmatprep.mubr.msk.f32.mxu0 %vm27_vm0, %v14_v2  ;;  %v16_v4 = vld [vmem:[%s185_s1] sm:$0xff] }
   0x3   :  { %126 = vmatpush3.msra.mxu0 %v19_v0  ;;  %v15_v5 = vld [vmem:[%s186_s0 + $0x8] sm:$0xff]  ;;  %v116_v6 = vld [vmem:[%s187_s2] ss:$0 sm:$0xff] }
   0x4   :  { %127 = vmatprep.subr.mxu0 %v18_v1 }
   0x5   :  { %128 = vmatpush3.msra.mxu0 %v18_v1 }
   0x6   :  { %129 = vmatprep.subr.mxu0 %v17_v3 }
   0x7   :  { %130 = vmatpush3.msra.mxu0 %v17_v3 }
   0x8   :  { %131 = vmatprep.subr.mxu0 %v16_v4 }
   0x9   :  { %132 = vmatpush3.msra.mxu0 %v16_v4 }
   0xa   :  { %134 = vmatmul.mubr.msk.f32.vlgmr.msra.gmra.mxu0 %vm27_vm0, %v15_v5 }
  0xca   :  { %v135_v7 = vpop.f32.mrf.mxu0 }
  0xcb   :  { %v106_v8 = vadd.f32 %v135_v7, %v116_v6 }
  0xcc   :  { %v100_v9 = vpop.f32.mrf.mxu0 }
  0xcd   :  { %111 = vst.msk [vmem:[%s188_s3 + $0x8] sm:$0xff] %vm109_vm1, %v106_v8  ;;  %v101_v10 = vadd.f32 %v116_v6, %v100_v9 }
  0xcf   :  { %110 = vst.msk [vmem:[%s188_s3] sm:$0xff] %vm109_vm1, %v101_v10 }

// kernel: decoder_layer_forward.13
= control target key start
LH: loop header
LB: loop body
LE: loop exit
PB: predicated region body
PF: predicated region fallthrough
CT: control target
= control target key end

     0   :  { %10 = vsyncpa [#allocation3], 0  ;;  %s1464_s0 = inlined_call_operand.vmem [shape: f32[2,8,32], index: 0, kind: input, shape index: {}]   ;;  %s1465_s1 = inlined_call_operand.vmem [shape: f32[2,8,64], index: 1, kind: input, shape index: {}]   ;;  %s1466_s2 = inlined_call_operand.vmem [shape: f32[2,1,8], index: 2, kind: input, shape index: {}]   ;;  %s1467_s3 = inlined_call_operand.vmem [shape: f32[2,8,32], index: 3, kind: output, shape index: {0}]   ;;  %s1468_s4 = inlined_call_operand.hbm [shape: f32[2,8,8], index: 4, kind: output, shape index: {1}]  }
   0x1   :  { %12 = vsyncpa [#allocation3 + $0x1], 0  ;;  %s1300_s15 = smov 0   ;;  %s1302_s16 = smov 0  }
   0x2   :  { %s1304_s17 = smov 0   ;;  %s1306_s18 = smov 0  }
   0x3 LB: > { %s1321_s19 = sadd.s32 4294967295, %s1260_s18   ;;  %s1052_s20 = sadd.s32 4294967294, %s1260_s18   ;;  %s1260_s18 = sphi %s1306_s18, %s1474_s18   ;;  %s1256_s17 = sphi %s1304_s17, %s1473_s17   ;;  %s1252_s16 = sphi %s1302_s16, %s1472_s16   ;;  %s1248_s15 = sphi %s1300_s15, %s1471_s15  }
   0x4   : > { %s1325_s21 = sadd.s32 1, %s1260_s18   ;;  %s129_s22 = sadd.s32 1, %s1256_s17 }
   0x5   : > { %s126_s23 = ssub.s32 %s1260_s18, %s1325_s21  ;;  %p139_p0 = scmp.ne.s32.totalorder %s1256_s17, %s1252_s16 }
   0x6   : > { %p127_p1 = scmp.eq.s32.totalorder %s126_s23, 0  ;;  %p140_p2 = scmp.eq.s32.totalorder %s1321_s19, 1 }
   0x7   : > { %p145_p3 = scmp.ne.s32.totalorder %s1252_s16, %s1248_s15  ;;  %p146_p4 = scmp.eq.s32.totalorder %s1052_s20, 1 }
   0x8   : > { %s1336_s24 = scalar_select %p127_p1, %s1256_s17, %s129_s22  }
   0x9   : > { %p1338_p5 = por %p140_p2, %p139_p0  ;;  %p1342_p6 = por %p146_p4, %p145_p3 }
   0xa   : > { %p1055_p7 = scmp.ge.s32.totalorder %s1260_s18, 1  ;;  %p184_p8 = scmp.lt.s32.totalorder %s1260_s18, 3 }
   0xc   : > { %p185_p9 = pnand %p1055_p7, %p184_p8 }
   0xd   : > { %p220_p10 = scmp.lt.s32.totalorder (!%p185_p9), %s1321_s19, 1  ;;  %s1264_s12 = smov (!%p185_p9), 96  }
   0xe   : > { %188 = sbr.rel (%p185_p9) target bundleno = 1363 (0x553), region = 32  ;;  %s1265_s13 = smov (!%p185_p9), 120  }
   0xf   : > { %s1266_s14 = smov (!%p185_p9), 112   ;;  %s1267_s20 = smov (!%p185_p9), 104  }
  0x10   : > { %s1268_s22 = smov (!%p185_p9), 88   ;;  %s1269_s23 = smov (!%p185_p9), 72  }
  0x11   : > { %s217_s29 = sand.u32 (!%p185_p9), 1, %s1252_s16   ;;  %s1074_s6 = sshll.u32 (!%p185_p9), %s1321_s19, 7 }
  0x12   : > { %s1056_s30 = sshll.u32 (!%p185_p9), %s217_s29, 3  ;;  %s946_s10 = scalar_lea.hbm (!%p185_p9), %s1468_s4, %s1074_s6 }
  0x13   : > { %v1262_v0 = vmov 0.0   ;;  %vm1263_vm0 = vmmov 0   ;;  %s221_s27 = scalar_select %p220_p10, %s1321_s19, 1  ;;  %vm244_vm1 = vcmask 64512  }
  0x14   : > { %1093 = vmatprep.subr.mxu0 %v1262_v0  ;;  %1095 = vmatprep.mubr.msk.f32.mxu0 %vm1263_vm0, %v1262_v0 }
  0x15   : > { %1098 = vmatprep.subr.mxu1 %v1262_v0  ;;  %1100 = vmatprep.mubr.msk.f32.mxu1 %vm1263_vm0, %v1262_v0  ;;  %s1356_s28 = sshll.u32 %s221_s27, 3  ;;  %s230_s11 = scalar_lea.vmem %s1466_s2, %s221_s27 }
  0x16   : > { %s227_s5 = scalar_lea.vmem %s1465_s1, %s1356_s28  ;;  %s223_s8 = scalar_lea.vmem %s1464_s0, %s1356_s28  ;;  %v1060_v3 = vld [vmem:[%s230_s11] ss:$0 sm:$0xff] }
  0x17   : > { %v1366_v1 = vld [vmem:[%s227_s5] sm:$0xff]  ;;  %s1270_s27 = smov 80   ;;  %s219_s5 = scalar_lea.vmem [#allocation2], %s1056_s30 }
  0x18   : > { %1094 = vmatpush3.xpose.msk.msra.mxu0 %vm244_vm1, %v1366_v1  ;;  %v235_v2 = vld [vmem:[%s223_s8] sm:$0xff]  ;;  %332 = vrot.lane.b32.xlu1 %v1366_v1, %s1264_s12  ;;  %s948_s7 = sshll.u32 %s219_s5, 4  ;;  %s932_s11 = scalar_lea.sflag [#allocation3], %s217_s29  ;;  %s949_s7 = int_to_ptr.vmem [resolvable:$true] %s948_s7 }
  0x19   : > { %1108 = vmatprep.subr.mxu0 %v1262_v0  ;;  %s1200_s12 = scalar_lea.vmem %s949_s7, 128 }
  0x1a   : > { %p1201_p11 = scmp.ne.s32.totalorder %s949_s7, %s1200_s12 }
  0x1b   : > { %1096 = vmatmul.mubr.msk.f32.vlgmr.msra.gmra.mxu0 %vm244_vm1, %v235_v2 }
  0x1c   : > { %1110 = vmatprep.mubr.msk.f32.mxu0 %vm1263_vm0, %v1262_v0  ;;  %410 = vrot.lane.b32.xlu1 %v1366_v1, %s1265_s13  ;;  %p1202_p12 = pnand %p1201_p11, %p1338_p5 }
  0x1e   : > { %p1203_p13 = pneg %p1202_p12 }
  0x20   : > { %576 = vrot.lane.b32.xlu1 %v1366_v1, %s1266_s14 }
  0x24   : > { %574 = vrot.lane.b32.xlu1 %v235_v2, %s1266_s14 }
  0x28   : > { %742 = vrot.lane.b32.xlu1 %v1366_v1, %s1267_s20 }
  0x2c   : > { %740 = vrot.lane.b32.xlu1 %v235_v2, %s1267_s20 }
  0x8a   : > { %v333_v13 = vpop.permute.xlu1 %332 }
  0x8b   : > { %1099 = vmatpush3.msra.mxu1 %v333_v13 }
  0x8c   : > { %1103 = vmatprep.subr.mxu1 %v1262_v0 }
  0x8e   : > { %v411_v15 = vpop.permute.xlu1 %410 }
  0x92   : > { %v577_v16 = vpop.permute.xlu1 %576 }
  0x96   : > { %v575_v18 = vpop.permute.xlu1 %574 }
  0x9a   : > { %v743_v21 = vpop.permute.xlu1 %742 }
  0x9e   : > { %v741_v22 = vpop.permute.xlu1 %740 }
  0xdb   : > { %v317_v4 = vpop.f32.mrf.mxu0 }
  0xdc   : > { %v318_v5 = vadd.f32 %v1060_v3, %v317_v4 }
  0xdd   : > { %v1097_v6 = vpop.f32.mrf.mxu0 }
  0xde   : > { %v321_v7 = vsel %vm244_vm1, %v318_v5, -inf }
  0xdf   : > { %322 = vmax.xlane.f32.xlu0 %v321_v7 }
 0x168   : > { %v323_v8 = vpop.xlane.xlu0 %322 }
 0x169   : > { %v324_v9 = vsub.f32 %v318_v5, %v323_v8 }
 0x16b   : > { %v325_v10 = vmul.f32 1.442695, %v324_v9 }
 0x16d   : > { %1184 = vpow2.f32 %v325_v10 }
 0x17a   : > { %v1185_v11 = vpop.eup %1184 }
 0x17b   : > { %v327_v12 = vsel %vm244_vm1, %v1185_v11, 0.0 }
 0x17c   : > { %328 = vadd.xlane.f32.xlu0 %v327_v12 }
 0x192   : > { %408 = vrot.lane.b32.xlu0 %v235_v2, %s1265_s13  ;;  %s1271_s13 = smov [#allocation2]  }
 0x193   : > { %s1204_s14 = sshll.u32 %s1271_s13, 4  ;;  %s1205_s14 = int_to_ptr.vmem [resolvable:$false] %s1204_s14 }
 0x194   : > { %s1206_s20 = scalar_lea.vmem %s1205_s14, 256  ;;  %p1207_p0 = scmp.lt.s32.totalorder %s949_s7, %s1205_s14 }
 0x195   : > { %p1208_p1 = scmp.lt.s32.totalorder %s1206_s20, %s1200_s12 }
 0x197   : > { %p1209_p2 = por %p1208_p1, %p1207_p0 }
 0x199   : > { %p1210_p3 = pnand %p1209_p2, %p1203_p13 }
 0x205   : > { %v329_v14 = vpop.xlane.xlu0 %328 }
 0x206   : > { %1186 = vrcp.f32 %v329_v14 }
 0x209   : > { %v409_v20 = vpop.permute.xlu0 %408 }
 0x213   : > { %v1187_v17 = vpop.eup %1186 }
 0x214   : > { %v1384_v19 = vmul.f32 %v1187_v17, %v1185_v11 }
 0x216   : > { %1101 = vmatmul.mubr.msk.f32.vlgmr.msra.gmra.mxu1 %vm244_vm1, %v1384_v19 }
 0x217   : > { %1104 = vmatpush3.xpose.msk.msra.mxu1 %vm244_vm1, %v411_v15  ;;  %1105 = vmatprep.mubr.msk.f32.mxu1 %vm1263_vm0, %v1262_v0 }
 0x218   : > { %1113 = vmatprep.subr.mxu1 %v1262_v0 }
 0x21a   : > { %1106 = vmatmul.mubr.msk.f32.vlgmr.msra.gmra.mxu1 %vm244_vm1, %v409_v20 }
 0x21b   : > { %1114 = vmatpush3.xpose.msk.msra.mxu1 %vm244_vm1, %v577_v16  ;;  %1115 = vmatprep.mubr.msk.f32.mxu1 %vm1263_vm0, %v1262_v0 }
 0x21c   : > { %1123 = vmatprep.subr.mxu1 %v1262_v0 }
 0x21e   : > { %1116 = vmatmul.mubr.msk.f32.vlgmr.msra.gmra.mxu1 %vm244_vm1, %v575_v18 }
 0x21f   : > { %1124 = vmatpush3.xpose.msk.msra.mxu1 %vm244_vm1, %v743_v21  ;;  %1125 = vmatprep.mubr.msk.f32.mxu1 %vm1263_vm0, %v1262_v0 }
 0x222   : > { %1126 = vmatmul.mubr.msk.f32.vlgmr.msra.gmra.mxu1 %vm244_vm1, %v741_v22 }
 0x2d6   : > { %v1402_v23 = vpop.f32.mrf.mxu1 }
 0x2d8   : > { %v1102_v24 = vpop.f32.mrf.mxu1 }
 0x2da   : > { %v482_v25 = vpop.f32.mrf.mxu1 }
 0x2db   : > { %v483_v26 = vadd.f32 %v1060_v3, %v482_v25 }
 0x2dc   : > { %v1107_v27 = vpop.f32.mrf.mxu1 }
 0x2dd   : > { %v486_v28 = vsel %vm244_vm1, %v483_v26, -inf }
 0x2de   : > { %487 = vmax.xlane.f32.xlu1 %v486_v28  ;;  %v648_v29 = vpop.f32.mrf.mxu1 }
 0x2df   : > { %v649_v30 = vadd.f32 %v1060_v3, %v648_v29 }
 0x2e0   : > { %v1117_v31 = vpop.f32.mrf.mxu1 }
 0x2e1   : > { %v652_v32 = vsel %vm244_vm1, %v649_v30, -inf }
 0x2e2   : > { %653 = vmax.xlane.f32.xlu0 %v652_v32  ;;  %v814_v33 = vpop.f32.mrf.mxu1 }
 0x2e3   : > { %v815_v34 = vadd.f32 %v1060_v3, %v814_v33 }
 0x2e4   : > { %v1127_v35 = vpop.f32.mrf.mxu1 }
 0x2e5   : > { %v818_v36 = vsel %vm244_vm1, %v815_v34, -inf }
 0x2e6   : > { %819 = vmax.xlane.f32.xlu1 %v818_v36 }
 0x2f7   : > { %497 = vrot.lane.b32.xlu1 %v1366_v1, %s1268_s22 }
 0x367   : > { %v488_v37 = vpop.xlane.xlu1 %487 }
 0x368   : > { %v489_v38 = vsub.f32 %v483_v26, %v488_v37 }
 0x36a   : > { %v490_v39 = vmul.f32 1.442695, %v489_v38 }
 0x36b   : > { %v654_v40 = vpop.xlane.xlu0 %653 }
 0x36c   : > { %1188 = vpow2.f32 %v490_v39  ;;  %v655_v41 = vsub.f32 %v649_v30, %v654_v40 }
 0x36e   : > { %v656_v42 = vmul.f32 1.442695, %v655_v41 }
 0x36f   : > { %v820_v43 = vpop.xlane.xlu1 %819 }
 0x370   : > { %1190 = vpow2.f32 %v656_v42  ;;  %v821_v44 = vsub.f32 %v815_v34, %v820_v43 }
 0x372   : > { %v822_v45 = vmul.f32 1.442695, %v821_v44 }
 0x373   : > { %v498_v46 = vpop.permute.xlu1 %497 }
 0x374   : > { %1192 = vpow2.f32 %v822_v45  ;;  %1109 = vmatpush3.msra.mxu0 %v498_v46 }
 0x375   : > { %1118 = vmatprep.subr.mxu0 %v1262_v0 }
 0x379   : > { %v1189_v47 = vpop.eup %1188 }
 0x37a   : > { %v492_v48 = vsel %vm244_vm1, %v1189_v47, 0.0 }
 0x37b   : > { %493 = vadd.xlane.f32.xlu0 %v492_v48 }
 0x37d   : > { %v1191_v49 = vpop.eup %1190 }
 0x37e   : > { %v658_v50 = vsel %vm244_vm1, %v1191_v49, 0.0 }
 0x37f   : > { %659 = vadd.xlane.f32.xlu1 %v658_v50 }
 0x381   : > { %v1193_v51 = vpop.eup %1192 }
 0x382   : > { %v824_v52 = vsel %vm244_vm1, %v1193_v51, 0.0 }
 0x383   : > { %825 = vadd.xlane.f32.xlu0 %v824_v52 }
 0x390   : > { %829 = vrot.lane.b32.xlu1 %v1366_v1, %s1269_s23 }
 0x399   : > { %663 = vrot.lane.b32.xlu0 %v1366_v1, %s1270_s27 }
 0x404   : > { %v494_v53 = vpop.xlane.xlu0 %493 }
 0x405   : > { %1194 = vrcp.f32 %v494_v53 }
 0x408   : > { %v660_v54 = vpop.xlane.xlu1 %659 }
 0x409   : > { %1196 = vrcp.f32 %v660_v54 }
 0x40c   : > { %v826_v55 = vpop.xlane.xlu0 %825  ;;  %v830_v60 = vpop.permute.xlu1 %829 }
 0x40d   : > { %1198 = vrcp.f32 %v826_v55 }
 0x410   : > { %v664_v57 = vpop.permute.xlu0 %663 }
 0x412   : > { %v1195_v56 = vpop.eup %1194 }
 0x413   : > { %v496_v58 = vmul.f32 %v1195_v56, %v1189_v47 }
 0x415   : > { %1111 = vmatmul.mubr.msk.f32.vlgmr.msra.gmra.mxu0 %vm244_vm1, %v496_v58  ;;  %v573_v62 = vadd.f32 %v496_v58, %v1384_v19 }
 0x416   : > { %v1197_v59 = vpop.eup %1196  ;;  %1119 = vmatpush3.msra.mxu0 %v664_v57  ;;  %1120 = vmatprep.mubr.msk.f32.mxu0 %vm1263_vm0, %v1262_v0 }
 0x417   : > { %1128 = vmatprep.subr.mxu0 %v1262_v0  ;;  %v662_v61 = vmul.f32 %v1197_v59, %v1191_v49 }
 0x419   : > { %1121 = vmatmul.mubr.msk.f32.vlgmr.msra.gmra.mxu0 %vm244_vm1, %v662_v61  ;;  %v739_v2 = vadd.f32 %v662_v61, %v573_v62 }
 0x41a   : > { %v1199_v63 = vpop.eup %1198  ;;  %1129 = vmatpush3.msra.mxu0 %v830_v60  ;;  %1130 = vmatprep.mubr.msk.f32.mxu0 %vm1263_vm0, %v1262_v0 }
 0x41b   : > { %v828_v1 = vmul.f32 %v1199_v63, %v1193_v51 }
 0x41d   : > { %1131 = vmatmul.mubr.msk.f32.vlgmr.msra.gmra.mxu0 %vm244_vm1, %v828_v1  ;;  %v905_v3 = vadd.f32 %v828_v1, %v739_v2 }
 0x41f   : > { %v925_v4 = vmul.f32 0.25, %v905_v3 }
 0x421   : > { %926 = vst.msk [vmem:[%s219_s5] sm:$0xff] %vm244_vm1, %v925_v4 }
 0x422   : > { %1213 = shalt.err (!%p1210_p3)
}
 0x423   : > { %s1214_s19 = scalar_lea.hbm %s946_s10, 128  ;;  %s1218_s27 = scalar_lea.hbm %s1468_s4, 256 }
 0x424   : > { %p1215_p4 = scmp.ne.s32.totalorder %s946_s10, %s1214_s19  ;;  %p1219_p9 = scmp.lt.s32.totalorder %s946_s10, %s1468_s4 }
 0x425   : > { %p1220_p10 = scmp.lt.s32.totalorder %s1218_s27, %s1214_s19 }
 0x426   : > { %p1216_p7 = pnand %p1215_p4, %p1338_p5 }
 0x427   : > { %p1221_p11 = por %p1220_p10, %p1219_p9 }
 0x428   : > { %p1217_p8 = pneg %p1216_p7 }
 0x42a   : > { %p1222_p12 = pnand %p1221_p11, %p1217_p8 }
 0x42c   : > { %1225 = shalt.err (!%p1222_p12)
}
 0x42d   : > { %1133 = dma.vmem_to_hbm [thread:$0]  (%p1338_p5), %s949_s7, 128, %s946_s10, %s932_s11   ;;  %vm919_vm2 = vcmask 130048   ;;  %vm921_vm3 = vcmask 195584   ;;  %vm923_vm4 = vcmask 261120  }
 0x42e   : > { %s1272_s5 = smov 8   ;;  %s1273_s6 = smov 16  }
 0x42f   : > { %s1274_s8 = smov 24   ;;  %s234_s9 = scalar_lea.vmem %s1467_s3, %s1356_s28 }
 0x4d5   : > { %v569_v0 = vpop.f32.mrf.mxu0 }
 0x4d6   : > { %907 = vrot.lane.b32.xlu1 %v569_v0, %s1272_s5 }
 0x4d7   : > { %v1112_v5 = vpop.f32.mrf.mxu0 }
 0x4d9   : > { %v735_v6 = vpop.f32.mrf.mxu0 }
 0x4da   : > { %911 = vrot.lane.b32.xlu0 %v735_v6, %s1273_s6 }
 0x4db   : > { %v1122_v7 = vpop.f32.mrf.mxu0 }
 0x4dd   : > { %v901_v8 = vpop.f32.mrf.mxu0 }
 0x4de   : > { %915 = vrot.lane.b32.xlu1 %v901_v8, %s1274_s8 }
 0x4df   : > { %v1132_v9 = vpop.f32.mrf.mxu0 }
 0x548   : > { %v908_v10 = vpop.permute.xlu1 %907 }
 0x549   : > { %v918_v12 = vsel %vm244_vm1, %v1402_v23, %v908_v10 }
 0x54c   : > { %v912_v11 = vpop.permute.xlu0 %911 }
 0x54d   : > { %v920_v13 = vsel %vm919_vm2, %v918_v12, %v912_v11 }
 0x550   : > { %v916_v14 = vpop.permute.xlu1 %915 }
 0x551   : > { %v922_v15 = vsel %vm921_vm3, %v920_v13, %v916_v14 }
 0x552   : > { %924 = vst.msk [vmem:[%s234_s9] sm:$0xff] %vm923_vm4, %v922_v15 }
 0x553 PF: > { %p1139_p5 = scmp.ge.s32.totalorder %s1260_s18, 2  ;;  %s967_s10 = sand.u32 1, %s1248_s15  }
 0x554   : > { %s968_s11 = scalar_lea.sflag [#allocation3], %s967_s10 }
 0x555   : > { %p1136_p13 = pnand %p1139_p5, %p1342_p6 }
 0x557   : > { %p1137_p0 = pneg %p1136_p13 }
 0x559   : > { %1243 = dma.done.wait (%p1137_p0), %s968_s11, 128  }
 0x55a   : > { %1245 = vsyncadd (%p1137_p0), %s968_s11, 4294967168  ;;  %p15_p1 = scmp.ge.s32.totalorder %s1325_s21, 4   ;;  %s1471_s15 = smov %s1252_s16 }
 0x55b   : > { %s1472_s16 = smov %s1256_s17  ;;  %s1473_s17 = smov %s1336_s24 }
 0x55c   : > { %s1474_s18 = smov %s1325_s21  ;;  %17 = sbr.rel (!%p15_p1) target bundleno = 3 (0x3), region = 85 }
 0x561   :  { %973 = vsyncpa [#allocation3], 1 }
 0x562   :  { %975 = vsyncpa [#allocation3 + $0x1], 1 }

// kernel: decoder_layer_forward.15
= control target key start
LH: loop header
LB: loop body
LE: loop exit
PB: predicated region body
PF: predicated region fallthrough
CT: control target
= control target key end

     0   :  { %vm30_vm0 = vcmask 261120   ;;  %v354_v14 = vmov 0.0   ;;  %vm140_vm1 = vcmask 523264   ;;  %s471_s1 = inlined_call_operand.vmem [shape: f32[32,64], index: 1, kind: input, shape index: {}]   ;;  %s472_s0 = inlined_call_operand.vmem [shape: f32[16,32], index: 0, kind: input, shape index: {}]   ;;  %s473_s3 = inlined_call_operand.vmem [shape: f32[64,32], index: 3, kind: input, shape index: {}]   ;;  %s474_s2 = inlined_call_operand.vmem [shape: f32[1,64], index: 2, kind: input, shape index: {}]   ;;  %s475_s4 = inlined_call_operand.vmem [shape: f32[1,32], index: 4, kind: input, shape index: {}]   ;;  %s476_s5 = inlined_call_operand.vmem [shape: f32[1,32], index: 5, kind: input, shape index: {}]   ;;  %s477_s6 = inlined_call_operand.vmem [shape: f32[1,32], index: 6, kind: input, shape index: {}]   ;;  %s478_s7 = inlined_call_operand.vmem [shape: f32[16,32], index: 7, kind: output, shape index: {}]  }
   0x1   :  { %v38_v0 = vld [vmem:[%s471_s1 + $0x18] sm:$0xff]  ;;  %v37_v1 = vld [vmem:[%s471_s1 + $0x10] sm:$0xff]  ;;  %v404_v2 = vld [vmem:[%s472_s0] sm:$0xff]  ;;  %32 = vst.msk [vmem:[#allocation2 + $0x8] sm:$0xff] %vm30_vm0, %v354_v14 }
   0x2   :  { %319 = vmatprep.subr.mxu0 %v38_v0  ;;  %v36_v3 = vld [vmem:[%s471_s1 + $0x8] sm:$0xff]  ;;  %327 = vmatprep.mubr.msk.f32.mxu0 %vm30_vm0, %v404_v2  ;;  %v139_v4 = vld [vmem:[%s473_s3 + $0x38] sm:$0xff]  ;;  %v138_v5 = vld [vmem:[%s473_s3 + $0x30] sm:$0xff]  ;;  %31 = vst.msk [vmem:[#allocation2] sm:$0xff] %vm30_vm0, %v354_v14 }
   0x3   :  { %320 = vmatpush3.msra.mxu0 %v38_v0  ;;  %330 = vmatprep.subr.mxu1 %v139_v4  ;;  %v35_v6 = vld [vmem:[%s471_s1] sm:$0xff]  ;;  %v137_v7 = vld [vmem:[%s473_s3 + $0x28] sm:$0xff]  ;;  %v135_v10 = vld [vmem:[%s473_s3 + $0x18] sm:$0xff] }
   0x4   :  { %321 = vmatprep.subr.mxu0 %v37_v1  ;;  %331 = vmatpush3.msra.mxu1 %v139_v4  ;;  %v34_v8 = vld [vmem:[%s472_s0 + $0x8] sm:$0xff]  ;;  %v136_v9 = vld [vmem:[%s473_s3 + $0x20] sm:$0xff]  ;;  %v134_v11 = vld [vmem:[%s473_s3 + $0x10] sm:$0xff] }
   0x5   :  { %322 = vmatpush3.msra.mxu0 %v37_v1  ;;  %332 = vmatprep.subr.mxu1 %v138_v5  ;;  %v133_v12 = vld [vmem:[%s473_s3 + $0x8] sm:$0xff]  ;;  %v132_v13 = vld [vmem:[%s473_s3] sm:$0xff] }
   0x6   :  { %323 = vmatprep.subr.mxu0 %v36_v3  ;;  %333 = vmatpush3.msra.mxu1 %v138_v5  ;;  %v295_v15 = vld [vmem:[%s474_s2] ss:$0 sm:$0xff] }
   0x7   :  { %324 = vmatpush3.msra.mxu0 %v36_v3  ;;  %334 = vmatprep.subr.mxu1 %v137_v7  ;;  %v300_v28 = vld [vmem:[%s475_s4] ss:$0 sm:$0xff] }
   0x8   :  { %325 = vmatprep.subr.mxu0 %v35_v6  ;;  %335 = vmatpush3.msra.mxu1 %v137_v7  ;;  %v131_v22 = vld [vmem:[#allocation2 + $0x8] sm:$0xff]  ;;  %v301_v54 = vld [vmem:[%s476_s5] ss:$0 sm:$0xff] }
   0x9   :  { %326 = vmatpush3.msra.mxu0 %v35_v6  ;;  %336 = vmatprep.subr.mxu1 %v136_v9  ;;  %v130_v24 = vld [vmem:[#allocation2] sm:$0xff] }
   0xa   :  { %328 = vmatmul.mubr.msk.f32.vlgmr.msra.gmra.mxu0 %vm30_vm0, %v34_v8  ;;  %337 = vmatpush3.msra.mxu1 %v136_v9  ;;  %v302_v56 = vld [vmem:[%s477_s6] ss:$0 sm:$0xff] }
   0xb   :  { %338 = vmatprep.subr.mxu1 %v135_v10 }
   0xc   :  { %339 = vmatpush3.msra.mxu1 %v135_v10 }
   0xd   :  { %340 = vmatprep.subr.mxu1 %v134_v11 }
   0xe   :  { %341 = vmatpush3.msra.mxu1 %v134_v11 }
   0xf   :  { %342 = vmatprep.subr.mxu1 %v133_v12 }
  0x10   :  { %343 = vmatpush3.msra.mxu1 %v133_v12 }
  0x11   :  { %344 = vmatprep.subr.mxu1 %v132_v13 }
  0x12   :  { %345 = vmatpush3.msra.mxu1 %v132_v13 }
  0xca   :  { %v329_v16 = vpop.f32.mrf.mxu0 }
  0xcb   :  { %v125_v17 = vadd.f32 %v329_v16, %v295_v15 }
  0xcc   :  { %v119_v18 = vpop.f32.mrf.mxu0 }
  0xcd   :  { %v120_v19 = vadd.f32 %v295_v15, %v119_v18  ;;  %v129_v21 = vmax.f32 %v125_v17, 0.0 }
  0xcf   :  { %v128_v20 = vmax.f32 %v120_v19, 0.0 }
  0xd1   :  { %346 = vmatprep.mubr.msk.f32.mxu1 %vm140_vm1, %v128_v20 }
  0xd2   :  { %347 = vmatmul.mubr.msk.f32.vlgmr.msra.gmra.mxu1 %vm140_vm1, %v129_v21 }
 0x192   :  { %v348_v23 = vpop.f32.mrf.mxu1 }
 0x193   :  { %v223_v25 = vadd.f32 %v348_v23, %v131_v22 }
 0x194   :  { %v213_v26 = vpop.f32.mrf.mxu1 }
 0x195   :  { %225 = vst.msk [vmem:[#allocation2 + $0x8] sm:$0xff] %vm30_vm0, %v223_v25  ;;  %v222_v27 = vadd.f32 %v213_v26, %v130_v24 }
 0x197   :  { %224 = vst.msk [vmem:[#allocation2] sm:$0xff] %vm30_vm0, %v222_v27 }
 0x19c   :  { %v230_v29 = vld [vmem:[#allocation2 + $0x8] sm:$0xff] }
 0x19d   :  { %v239_v32 = vadd.f32 %v300_v28, %v230_v29 }
 0x19e   :  { %v229_v30 = vld [vmem:[#allocation2] sm:$0xff] }
 0x19f   :  { %v238_v31 = vadd.f32 %v300_v28, %v229_v30  ;;  %v243_v35 = vadd.f32 %v239_v32, %v34_v8 }
 0x1a1   :  { %v242_v33 = vadd.f32 %v238_v31, %v404_v2  ;;  %v247_v36 = vsel %vm30_vm0, %v243_v35, 0.0 }
 0x1a3   :  { %v244_v34 = vsel %vm30_vm0, %v242_v33, 0.0 }
 0x1a4   :  { %245 = vadd.xlane.f32.xlu0 %v244_v34 }
 0x1a8   :  { %248 = vadd.xlane.f32.xlu0 %v247_v36 }
 0x22d   :  { %v246_v37 = vpop.xlane.xlu0 %245 }
 0x22e   :  { %v251_v38 = vmul.f32 0.03125, %v246_v37 }
 0x230   :  { %v253_v39 = vsub.f32 %v242_v33, %v251_v38 }
 0x231   :  { %v249_v40 = vpop.xlane.xlu0 %248 }
 0x232   :  { %v252_v41 = vmul.f32 0.03125, %v249_v40  ;;  %v255_v42 = vmul.f32 %v253_v39, %v253_v39 }
 0x234   :  { %v254_v43 = vsub.f32 %v243_v35, %v252_v41  ;;  %v257_v44 = vsel %vm30_vm0, %v255_v42, 0.0 }
 0x235   :  { %258 = vadd.xlane.f32.xlu1 %v257_v44 }
 0x236   :  { %v256_v45 = vmul.f32 %v254_v43, %v254_v43 }
 0x238   :  { %v260_v46 = vsel %vm30_vm0, %v256_v45, 0.0 }
 0x239   :  { %261 = vadd.xlane.f32.xlu1 %v260_v46 }
 0x2be   :  { %v259_v47 = vpop.xlane.xlu1 %258 }
 0x2bf   :  { %v263_v48 = vmul.f32 0.03125, %v259_v47 }
 0x2c1   :  { %v265_v49 = vadd.f32 1e-05, %v263_v48 }
 0x2c2   :  { %v262_v50 = vpop.xlane.xlu1 %261 }
 0x2c3   :  { %350 = vrsqrt.f32 %v265_v49  ;;  %v264_v51 = vmul.f32 0.03125, %v262_v50 }
 0x2c5   :  { %v266_v52 = vadd.f32 1e-05, %v264_v51 }
 0x2c7   :  { %352 = vrsqrt.f32 %v266_v52 }
 0x2d0   :  { %v351_v53 = vpop.eup %350 }
 0x2d1   :  { %v269_v55 = vmul.f32 %v351_v53, %v253_v39 }
 0x2d3   :  { %v278_v57 = vmul.f32 %v301_v54, %v269_v55 }
 0x2d4   :  { %v353_v58 = vpop.eup %352 }
 0x2d5   :  { %v287_v59 = vadd.f32 %v302_v56, %v278_v57  ;;  %v270_v60 = vmul.f32 %v353_v58, %v254_v43 }
 0x2d7   :  { %289 = vst.msk [vmem:[%s478_s7] sm:$0xff] %vm30_vm0, %v287_v59  ;;  %v279_v61 = vmul.f32 %v301_v54, %v270_v60 }
 0x2d9   :  { %v288_v62 = vadd.f32 %v302_v56, %v279_v61 }
 0x2db   :  { %290 = vst.msk [vmem:[%s478_s7 + $0x8] sm:$0xff] %vm30_vm0, %v288_v62 }

</bundles_post_ra>
